<compile_context>
chip_gen: v7x
topology: tpu7x:2x2x1
jax: 0.10.0
libtpu: 0.0.40
codegen_flags: <defaults>
</compile_context>

<pallas_src>
import jax
import jax.numpy as jnp
from jax.experimental import pallas as pl
from jax.experimental.pallas import tpu as pltpu

# ---------------- small synthetic CLIP-ViT config ----------------
B = 2                 # batch
C = 3                 # RGB channels
IMG = 16              # image side
PATCH = 8             # patch side (kernel == stride)
N_PATCH = (IMG // PATCH) ** 2          # 4
SEQ = N_PATCH + 1                      # 5  (CLS + patches)
SEQ_PAD = 8                            # padded token count (sublane multiple)
HIDDEN = 32
HEADS = 4
HEAD_DIM = HIDDEN // HEADS             # 8
MLP = 64
PROJ = 16
LAYERS = 2
EPS = 1e-5
CPP = C * PATCH * PATCH                # 192


# ---------------- in-kernel helpers ----------------
def _layernorm(x, gamma, beta):
    mu = jnp.mean(x, axis=-1, keepdims=True)
    var = jnp.mean(jnp.square(x - mu), axis=-1, keepdims=True)
    return (x - mu) * jax.lax.rsqrt(var + EPS) * gamma + beta


# ---------------- fused Pallas kernel (whole image tower) ----------------
def clip_fused_kernel(patches_ref, w_patch_ref, tok_bias_ref, pre_ln_ref,
                      w_attn_ref, b_attn_ref, ln_ref,
                      w_fc1_ref, b_fc1_ref, w_fc2_ref, b_fc2_ref,
                      post_ln_ref, w_proj_ref, out_ref):
    # ---- patch embedding (+ CLS token + positional embedding) ----
    # patches_ref[0]: [SEQ_PAD, CPP]  (row 0 = CLS slot zeros, rows >= SEQ zeros)
    x = jnp.dot(patches_ref[0], w_patch_ref[...],
                preferred_element_type=jnp.float32) + tok_bias_ref[...]

    # ---- pre layernorm ----
    pre = pre_ln_ref[...]                           # [2, H]
    x = _layernorm(x, pre[0:1, :], pre[1:2, :])

    # key-padding mask: padded key columns (>= SEQ) get -1e30 before softmax
    kidx = jax.lax.broadcasted_iota(jnp.int32, (SEQ_PAD, SEQ_PAD), 1)
    neg_mask = jnp.where(kidx < SEQ, 0.0, -1e30).astype(jnp.float32)

    scale = HEAD_DIM ** -0.5
    for l in range(LAYERS):                         # static unrolled (LAYERS=2)
        wa = w_attn_ref[l]                          # [H, 4H]  (wq|wk|wv|wo)
        ba = b_attn_ref[l]                          # [1, 4H]
        lnp = ln_ref[l]                             # [4, H]   (g1,b1,g2,b2)

        # --- self attention (pre-LN) ---
        h = _layernorm(x, lnp[0:1, :], lnp[1:2, :])
        qkv = jnp.dot(h, wa[:, :3 * HIDDEN],
                      preferred_element_type=jnp.float32) + ba[:, :3 * HIDDEN]
        q = qkv[:, :HIDDEN] * scale
        k = qkv[:, HIDDEN:2 * HIDDEN]
        v = qkv[:, 2 * HIDDEN:3 * HIDDEN]

        ctx_heads = []
        for hd in range(HEADS):                     # static unrolled tiny dots
            sl = slice(hd * HEAD_DIM, (hd + 1) * HEAD_DIM)
            s = jnp.dot(q[:, sl], k[:, sl].T,
                        preferred_element_type=jnp.float32) + neg_mask
            s = s - jnp.max(s, axis=-1, keepdims=True)
            p = jnp.exp(s)
            p = p * pl.reciprocal(jnp.sum(p, axis=-1, keepdims=True), approx=True)
            ctx_heads.append(jnp.dot(p, v[:, sl],
                                     preferred_element_type=jnp.float32))
        ctx = jnp.concatenate(ctx_heads, axis=-1)   # [SEQ_PAD, H]
        attn = jnp.dot(ctx, wa[:, 3 * HIDDEN:],     # single output projection
                       preferred_element_type=jnp.float32) + ba[:, 3 * HIDDEN:]
        x = x + attn

        # --- MLP (pre-LN, quick_gelu) ---
        h2 = _layernorm(x, lnp[2:3, :], lnp[3:4, :])
        f = jnp.dot(h2, w_fc1_ref[l],
                    preferred_element_type=jnp.float32) + b_fc1_ref[l]
        f = f * jax.nn.sigmoid(1.702 * f)           # quick_gelu
        x = x + jnp.dot(f, w_fc2_ref[l],
                        preferred_element_type=jnp.float32) + b_fc2_ref[l]

    # ---- head: post-LN on CLS token, visual projection, L2 normalize ----
    post = post_ln_ref[...]                         # [2, H]
    pooled = _layernorm(x[0:1, :], post[0:1, :], post[1:2, :])
    feat = jnp.dot(pooled, w_proj_ref[...], preferred_element_type=jnp.float32)
    inv = jax.lax.rsqrt(jnp.sum(jnp.square(feat), axis=-1, keepdims=True) + 1e-12)
    out_ref[0] = feat * inv


# ---------------- pallas_call wrapper ----------------
def _rep(arr):
    """BlockSpec for a weight replicated (resident) across the batch grid."""
    n = arr.ndim
    return pl.BlockSpec(arr.shape, lambda b, _n=n: (0,) * _n)


def clip_image_features(image, params):
    pixels = preprocess(image)
    patches = patchify(pixels)                                   # [B, N_PATCH, CPP]
    # pad: row 0 = CLS slot (zeros), rows SEQ..SEQ_PAD-1 = zeros
    patches_pad = jnp.pad(patches, ((0, 0), (1, SEQ_PAD - SEQ), (0, 0)))

    weight_args = (params['w_patch'], params['tok_bias'], params['pre_ln'],
                   params['w_attn'], params['b_attn'], params['ln'],
                   params['w_fc1'], params['b_fc1'], params['w_fc2'],
                   params['b_fc2'], params['post_ln'], params['w_proj'])

    out = pl.pallas_call(
        clip_fused_kernel,
        out_shape=jax.ShapeDtypeStruct((B, 1, PROJ), jnp.float32),
        grid_spec=pltpu.PrefetchScalarGridSpec(
            num_scalar_prefetch=0,
            grid=(B,),
            in_specs=[pl.BlockSpec((1, SEQ_PAD, CPP), lambda b: (b, 0, 0))]
                     + [_rep(w) for w in weight_args],
            out_specs=pl.BlockSpec((1, 1, PROJ), lambda b: (b, 0, 0))),
        compiler_params=pltpu.CompilerParams(
            dimension_semantics=("parallel",)),
    )(patches_pad, *weight_args)
    return out[:, 0, :]                                          # [B, PROJ]


# ---------------- plain-JAX glue (processor normalization, im2col) ----------------
_CLIP_MEAN = jnp.array([0.48145466, 0.4578275, 0.40821073], jnp.float32)
_CLIP_STD = jnp.array([0.26862954, 0.26130258, 0.27577711], jnp.float32)


def preprocess(image):
    # processor per-channel normalization (resize omitted, see TODO at top)
    return (image - _CLIP_MEAN.reshape(1, C, 1, 1)) / _CLIP_STD.reshape(1, C, 1, 1)


def patchify(x):
    # NCHW -> [B, N_PATCH, C*P*P] with (c, ph, pw) inner ordering (matches conv weight)
    nh = IMG // PATCH
    x = x.reshape(B, C, nh, PATCH, nh, PATCH)
    x = x.transpose(0, 2, 4, 1, 3, 5)
    return x.reshape(B, N_PATCH, CPP)


# ---------------- deterministic parameter init (packed layout) ----------------
def init_params(key):
    keys = iter(jax.random.split(key, 32))

    def nrm(shape, scale=0.02):
        return (scale * jax.random.normal(next(keys), shape)).astype(jnp.float32)

    cls = nrm((HIDDEN,))
    pos = nrm((SEQ, HIDDEN))
    tok_bias = jnp.zeros((SEQ_PAD, HIDDEN), jnp.float32)
    tok_bias = tok_bias.at[0].set(cls + pos[0])
    tok_bias = tok_bias.at[1:SEQ].set(pos[1:])

    def ln_pair():                                   # [2, H] = (gamma, beta)
        return jnp.stack([1.0 + nrm((HIDDEN,)), nrm((HIDDEN,))], axis=0)

    ln_rows = []
    for _ in range(LAYERS):                          # [4, H] = (g1, b1, g2, b2)
        ln_rows.append(jnp.stack([1.0 + nrm((HIDDEN,)), nrm((HIDDEN,)),
                                  1.0 + nrm((HIDDEN,)), nrm((HIDDEN,))], axis=0))

    return {
        'w_patch': nrm((CPP, HIDDEN)),
        'tok_bias': tok_bias,                        # [SEQ_PAD, H]  (cls + pos, padded)
        'pre_ln': ln_pair(),                         # [2, H]
        'post_ln': ln_pair(),                        # [2, H]
        'w_proj': nrm((HIDDEN, PROJ)),
        'w_attn': nrm((LAYERS, HIDDEN, 4 * HIDDEN)),  # wq|wk|wv|wo  (lane-dense 128)
        'b_attn': nrm((LAYERS, 1, 4 * HIDDEN)),
        'ln': jnp.stack(ln_rows, axis=0),            # [L, 4, H]
        'w_fc1': nrm((LAYERS, HIDDEN, MLP)),
        'b_fc1': nrm((LAYERS, 1, MLP)),
        'w_fc2': nrm((LAYERS, MLP, HIDDEN)),
        'b_fc2': nrm((LAYERS, 1, HIDDEN)),
    }


# ---------------- pure-JAX reference (for correctness check) ----------------
def _ref_ln(x, g, b):
    mu = x.mean(-1, keepdims=True)
    var = ((x - mu) ** 2).mean(-1, keepdims=True)
    return (x - mu) / jnp.sqrt(var + EPS) * g + b


def ref_forward(image, params):
    patches = patchify(preprocess(image))
    pe = jnp.einsum('bpd,dh->bph', patches, params['w_patch'])
    x = jnp.concatenate([jnp.zeros((B, 1, HIDDEN), jnp.float32), pe], axis=1)
    x = x + params['tok_bias'][None, :SEQ, :]
    x = _ref_ln(x, params['pre_ln'][0], params['pre_ln'][1])
    scale = HEAD_DIM ** -0.5
    for l in range(LAYERS):
        wa, ba = params['w_attn'][l], params['b_attn'][l, 0]
        lnp = params['ln'][l]
        h = _ref_ln(x, lnp[0], lnp[1])
        qkv = h @ wa[:, :3 * HIDDEN] + ba[:3 * HIDDEN]
        q = qkv[..., :HIDDEN] * scale
        k = qkv[..., HIDDEN:2 * HIDDEN]
        v = qkv[..., 2 * HIDDEN:]
        q = q.reshape(B, SEQ, HEADS, HEAD_DIM).transpose(0, 2, 1, 3)
        k = k.reshape(B, SEQ, HEADS, HEAD_DIM).transpose(0, 2, 1, 3)
        v = v.reshape(B, SEQ, HEADS, HEAD_DIM).transpose(0, 2, 1, 3)
        s = jnp.einsum('bhqd,bhkd->bhqk', q, k)
        p = jax.nn.softmax(s, axis=-1)
        ctx = jnp.einsum('bhqk,bhkd->bhqd', p, v).transpose(0, 2, 1, 3)
        ctx = ctx.reshape(B, SEQ, HIDDEN)
        x = x + ctx @ wa[:, 3 * HIDDEN:] + ba[3 * HIDDEN:]
        h2 = _ref_ln(x, lnp[2], lnp[3])
        f = h2 @ params['w_fc1'][l] + params['b_fc1'][l, 0]
        f = f * jax.nn.sigmoid(1.702 * f)
        x = x + f @ params['w_fc2'][l] + params['b_fc2'][l, 0]
    pooled = _ref_ln(x[:, 0, :], params['post_ln'][0], params['post_ln'][1])
    feat = pooled @ params['w_proj']
    return feat / jnp.linalg.norm(feat, axis=-1, keepdims=True)


# ---------------- main ----------------
if __name__ == "__main__":
    key = jax.random.PRNGKey(0)
    pkey, ikey = jax.random.split(key)
    params = init_params(pkey)
    # synthetic "image" pixel values in [0, 1], NCHW like PyTorch
    image = jax.random.uniform(ikey, (B, C, IMG, IMG), jnp.float32)

    out = jax.block_until_ready(clip_image_features(image, params))
    ref = ref_forward(image, params)

    assert out.shape == (B, PROJ), out.shape
    assert bool(jnp.all(jnp.isfinite(out)))
    # outputs are L2-normalized embeddings
    assert jnp.allclose(jnp.linalg.norm(out, axis=-1), 1.0, atol=1e-3)
    assert jnp.allclose(out, ref, atol=2e-2), (out, ref)
    print("KERNEL_OK")
</pallas_src>

<mosaic_0001>
module attributes {stable_mosaic.version = 11 : i64} {
  func.func @clip_fused_kernel(%arg0: i32, %arg1: memref<1x8x192xf32, #tpu.memory_space<vmem>>, %arg2: memref<192x32xf32, #tpu.memory_space<vmem>>, %arg3: memref<8x32xf32, #tpu.memory_space<vmem>>, %arg4: memref<2x32xf32, #tpu.memory_space<vmem>>, %arg5: memref<2x32x128xf32, #tpu.memory_space<vmem>>, %arg6: memref<2x1x128xf32, #tpu.memory_space<vmem>>, %arg7: memref<2x4x32xf32, #tpu.memory_space<vmem>>, %arg8: memref<2x32x64xf32, #tpu.memory_space<vmem>>, %arg9: memref<2x1x64xf32, #tpu.memory_space<vmem>>, %arg10: memref<2x64x32xf32, #tpu.memory_space<vmem>>, %arg11: memref<2x1x32xf32, #tpu.memory_space<vmem>>, %arg12: memref<2x32xf32, #tpu.memory_space<vmem>>, %arg13: memref<32x16xf32, #tpu.memory_space<vmem>>, %arg14: memref<1x1x16xf32, #tpu.memory_space<vmem>>) attributes {dimension_semantics = [#tpu.dimension_semantics<parallel>], iteration_bounds = array<i64: 2>, scalar_prefetch = 0 : i64, scratch_operands = 0 : i64, tpu.core_type = #tpu.core_type<tc>, window_params = [{transform_indices = @transform_0, window_bounds = array<i64: 1, 8, 192>}, {pipeline_mode = #tpu.pipeline_mode<synchronous>, transform_indices = @transform_1, window_bounds = array<i64: 192, 32>}, {pipeline_mode = #tpu.pipeline_mode<synchronous>, transform_indices = @transform_2, window_bounds = array<i64: 8, 32>}, {pipeline_mode = #tpu.pipeline_mode<synchronous>, transform_indices = @transform_3, window_bounds = array<i64: 2, 32>}, {pipeline_mode = #tpu.pipeline_mode<synchronous>, transform_indices = @transform_4, window_bounds = array<i64: 2, 32, 128>}, {pipeline_mode = #tpu.pipeline_mode<synchronous>, transform_indices = @transform_5, window_bounds = array<i64: 2, 1, 128>}, {pipeline_mode = #tpu.pipeline_mode<synchronous>, transform_indices = @transform_6, window_bounds = array<i64: 2, 4, 32>}, {pipeline_mode = #tpu.pipeline_mode<synchronous>, transform_indices = @transform_7, window_bounds = array<i64: 2, 32, 64>}, {pipeline_mode = #tpu.pipeline_mode<synchronous>, transform_indices = @transform_8, window_bounds = array<i64: 2, 1, 64>}, {pipeline_mode = #tpu.pipeline_mode<synchronous>, transform_indices = @transform_9, window_bounds = array<i64: 2, 64, 32>}, {pipeline_mode = #tpu.pipeline_mode<synchronous>, transform_indices = @transform_10, window_bounds = array<i64: 2, 1, 32>}, {pipeline_mode = #tpu.pipeline_mode<synchronous>, transform_indices = @transform_11, window_bounds = array<i64: 2, 32>}, {pipeline_mode = #tpu.pipeline_mode<synchronous>, transform_indices = @transform_12, window_bounds = array<i64: 32, 16>}, {transform_indices = @transform_13, window_bounds = array<i64: 1, 1, 16>}]} {
    %c0 = arith.constant 0 : index
    %c0_0 = arith.constant 0 : index
    %c0_1 = arith.constant 0 : index
    %0 = vector.load %arg1[%c0, %c0_0, %c0_1] : memref<1x8x192xf32, #tpu.memory_space<vmem>>, vector<1x8x192xf32>
    %1 = vector.shape_cast %0 : vector<1x8x192xf32> to vector<8x192xf32>
    %c0_2 = arith.constant 0 : index
    %c0_3 = arith.constant 0 : index
    %2 = vector.load %arg2[%c0_2, %c0_3] : memref<192x32xf32, #tpu.memory_space<vmem>>, vector<192x32xf32>
    %cst = arith.constant dense<0.000000e+00> : vector<8x32xf32>
    %3 = tpu.matmul %1, %2, %cst {dimension_numbers = #tpu.dot_dimension_numbers<[1], [0], [0], [1], [0, 0, 1, 1], [], []>} : vector<8x192xf32>, vector<192x32xf32>, vector<8x32xf32> -> vector<8x32xf32>
    %c0_4 = arith.constant 0 : index
    %c0_5 = arith.constant 0 : index
    %4 = vector.load %arg3[%c0_4, %c0_5] : memref<8x32xf32, #tpu.memory_space<vmem>>, vector<8x32xf32>
    %5 = arith.addf %3, %4 : vector<8x32xf32>
    %c0_6 = arith.constant 0 : index
    %c0_7 = arith.constant 0 : index
    %6 = vector.load %arg4[%c0_6, %c0_7] : memref<2x32xf32, #tpu.memory_space<vmem>>, vector<2x32xf32>
    %7 = vector.extract_strided_slice %6 {offsets = [0, 0], sizes = [1, 32], strides = [1, 1]} : vector<2x32xf32> to vector<1x32xf32>
    %8 = vector.extract_strided_slice %6 {offsets = [1, 0], sizes = [1, 32], strides = [1, 1]} : vector<2x32xf32> to vector<1x32xf32>
    %cst_8 = arith.constant dense<0.000000e+00> : vector<8xf32>
    %9 = vector.multi_reduction <add>, %5, %cst_8 [1] : vector<8x32xf32> to vector<8xf32>
    %10 = vector.shape_cast %9 : vector<8xf32> to vector<8x1xf32>
    %cst_9 = arith.constant 3.200000e+01 : f32
    %11 = vector.broadcast %cst_9 : f32 to vector<8x1xf32>
    %12 = arith.divf %10, %11 : vector<8x1xf32>
    %13 = vector.broadcast %12 : vector<8x1xf32> to vector<8x32xf32>
    %14 = arith.subf %5, %13 : vector<8x32xf32>
    %15 = arith.mulf %14, %14 : vector<8x32xf32>
    %cst_10 = arith.constant dense<0.000000e+00> : vector<8xf32>
    %16 = vector.multi_reduction <add>, %15, %cst_10 [1] : vector<8x32xf32> to vector<8xf32>
    %17 = vector.shape_cast %16 : vector<8xf32> to vector<8x1xf32>
    %cst_11 = arith.constant 3.200000e+01 : f32
    %18 = vector.broadcast %cst_11 : f32 to vector<8x1xf32>
    %19 = arith.divf %17, %18 : vector<8x1xf32>
    %20 = vector.broadcast %12 : vector<8x1xf32> to vector<8x32xf32>
    %21 = arith.subf %5, %20 : vector<8x32xf32>
    %cst_12 = arith.constant 9.99999974E-6 : f32
    %22 = vector.broadcast %cst_12 : f32 to vector<8x1xf32>
    %23 = arith.addf %19, %22 : vector<8x1xf32>
    %24 = math.rsqrt %23 : vector<8x1xf32>
    %25 = vector.broadcast %24 : vector<8x1xf32> to vector<8x32xf32>
    %26 = arith.mulf %21, %25 : vector<8x32xf32>
    %27 = vector.broadcast %7 : vector<1x32xf32> to vector<8x32xf32>
    %28 = arith.mulf %26, %27 : vector<8x32xf32>
    %29 = vector.broadcast %8 : vector<1x32xf32> to vector<8x32xf32>
    %30 = arith.addf %28, %29 : vector<8x32xf32>
    %31 = tpu.iota {dimensions = array<i32: 1>} : vector<8x8xi32>
    %c5_i32 = arith.constant 5 : i32
    %32 = vector.broadcast %c5_i32 : i32 to vector<8x8xi32>
    %33 = arith.cmpi slt, %31, %32 : vector<8x8xi32>
    %cst_13 = arith.constant 0.000000e+00 : f32
    %cst_14 = arith.constant -1.000000e+30 : f32
    %34 = vector.broadcast %cst_13 : f32 to vector<8x8xf32>
    %35 = vector.broadcast %cst_14 : f32 to vector<8x8xf32>
    %36 = arith.select %33, %34, %35 : vector<8x8xi1>, vector<8x8xf32>
    %c0_15 = arith.constant 0 : index
    %c0_16 = arith.constant 0 : index
    %c0_17 = arith.constant 0 : index
    %37 = vector.load %arg5[%c0_15, %c0_16, %c0_17] : memref<2x32x128xf32, #tpu.memory_space<vmem>>, vector<1x32x128xf32>
    %38 = vector.shape_cast %37 : vector<1x32x128xf32> to vector<32x128xf32>
    %c0_18 = arith.constant 0 : index
    %c0_19 = arith.constant 0 : index
    %c0_20 = arith.constant 0 : index
    %39 = vector.load %arg6[%c0_18, %c0_19, %c0_20] : memref<2x1x128xf32, #tpu.memory_space<vmem>>, vector<1x1x128xf32>
    %40 = vector.shape_cast %39 : vector<1x1x128xf32> to vector<1x128xf32>
    %c0_21 = arith.constant 0 : index
    %c0_22 = arith.constant 0 : index
    %c0_23 = arith.constant 0 : index
    %41 = vector.load %arg7[%c0_21, %c0_22, %c0_23] : memref<2x4x32xf32, #tpu.memory_space<vmem>>, vector<1x4x32xf32>
    %42 = vector.shape_cast %41 : vector<1x4x32xf32> to vector<4x32xf32>
    %43 = vector.extract_strided_slice %42 {offsets = [0, 0], sizes = [1, 32], strides = [1, 1]} : vector<4x32xf32> to vector<1x32xf32>
    %44 = vector.extract_strided_slice %42 {offsets = [1, 0], sizes = [1, 32], strides = [1, 1]} : vector<4x32xf32> to vector<1x32xf32>
    %cst_24 = arith.constant dense<0.000000e+00> : vector<8xf32>
    %45 = vector.multi_reduction <add>, %30, %cst_24 [1] : vector<8x32xf32> to vector<8xf32>
    %46 = vector.shape_cast %45 : vector<8xf32> to vector<8x1xf32>
    %cst_25 = arith.constant 3.200000e+01 : f32
    %47 = vector.broadcast %cst_25 : f32 to vector<8x1xf32>
    %48 = arith.divf %46, %47 : vector<8x1xf32>
    %49 = vector.broadcast %48 : vector<8x1xf32> to vector<8x32xf32>
    %50 = arith.subf %30, %49 : vector<8x32xf32>
    %51 = arith.mulf %50, %50 : vector<8x32xf32>
    %cst_26 = arith.constant dense<0.000000e+00> : vector<8xf32>
    %52 = vector.multi_reduction <add>, %51, %cst_26 [1] : vector<8x32xf32> to vector<8xf32>
    %53 = vector.shape_cast %52 : vector<8xf32> to vector<8x1xf32>
    %cst_27 = arith.constant 3.200000e+01 : f32
    %54 = vector.broadcast %cst_27 : f32 to vector<8x1xf32>
    %55 = arith.divf %53, %54 : vector<8x1xf32>
    %56 = vector.broadcast %48 : vector<8x1xf32> to vector<8x32xf32>
    %57 = arith.subf %30, %56 : vector<8x32xf32>
    %cst_28 = arith.constant 9.99999974E-6 : f32
    %58 = vector.broadcast %cst_28 : f32 to vector<8x1xf32>
    %59 = arith.addf %55, %58 : vector<8x1xf32>
    %60 = math.rsqrt %59 : vector<8x1xf32>
    %61 = vector.broadcast %60 : vector<8x1xf32> to vector<8x32xf32>
    %62 = arith.mulf %57, %61 : vector<8x32xf32>
    %63 = vector.broadcast %43 : vector<1x32xf32> to vector<8x32xf32>
    %64 = arith.mulf %62, %63 : vector<8x32xf32>
    %65 = vector.broadcast %44 : vector<1x32xf32> to vector<8x32xf32>
    %66 = arith.addf %64, %65 : vector<8x32xf32>
    %67 = vector.extract_strided_slice %38 {offsets = [0, 0], sizes = [32, 96], strides = [1, 1]} : vector<32x128xf32> to vector<32x96xf32>
    %cst_29 = arith.constant dense<0.000000e+00> : vector<8x96xf32>
    %68 = tpu.matmul %66, %67, %cst_29 {dimension_numbers = #tpu.dot_dimension_numbers<[1], [0], [0], [1], [0, 0, 1, 1], [], []>} : vector<8x32xf32>, vector<32x96xf32>, vector<8x96xf32> -> vector<8x96xf32>
    %69 = vector.extract_strided_slice %40 {offsets = [0, 0], sizes = [1, 96], strides = [1, 1]} : vector<1x128xf32> to vector<1x96xf32>
    %70 = vector.broadcast %69 : vector<1x96xf32> to vector<8x96xf32>
    %71 = arith.addf %68, %70 : vector<8x96xf32>
    %72 = vector.extract_strided_slice %71 {offsets = [0, 0], sizes = [8, 32], strides = [1, 1]} : vector<8x96xf32> to vector<8x32xf32>
    %cst_30 = arith.constant 0.353553385 : f32
    %73 = vector.broadcast %cst_30 : f32 to vector<8x32xf32>
    %74 = arith.mulf %72, %73 : vector<8x32xf32>
    %75 = vector.extract_strided_slice %71 {offsets = [0, 32], sizes = [8, 32], strides = [1, 1]} : vector<8x96xf32> to vector<8x32xf32>
    %76 = vector.extract_strided_slice %71 {offsets = [0, 64], sizes = [8, 32], strides = [1, 1]} : vector<8x96xf32> to vector<8x32xf32>
    %77 = vector.extract_strided_slice %74 {offsets = [0, 0], sizes = [8, 8], strides = [1, 1]} : vector<8x32xf32> to vector<8x8xf32>
    %78 = vector.extract_strided_slice %75 {offsets = [0, 0], sizes = [8, 8], strides = [1, 1]} : vector<8x32xf32> to vector<8x8xf32>
    %79 = tpu.transpose %78, [1, 0] : vector<8x8xf32> -> vector<8x8xf32>
    %cst_31 = arith.constant dense<0.000000e+00> : vector<8x8xf32>
    %80 = tpu.matmul %77, %79, %cst_31 {dimension_numbers = #tpu.dot_dimension_numbers<[1], [0], [0], [1], [0, 0, 1, 1], [], []>} : vector<8x8xf32>, vector<8x8xf32>, vector<8x8xf32> -> vector<8x8xf32>
    %81 = arith.addf %80, %36 : vector<8x8xf32>
    %cst_32 = arith.constant dense<0xFF800000> : vector<8xf32>
    %82 = vector.multi_reduction <maximumf>, %81, %cst_32 [1] : vector<8x8xf32> to vector<8xf32>
    %83 = vector.shape_cast %82 : vector<8xf32> to vector<8x1xf32>
    %84 = vector.broadcast %83 : vector<8x1xf32> to vector<8x8xf32>
    %85 = arith.subf %81, %84 : vector<8x8xf32>
    %86 = math.exp %85 : vector<8x8xf32>
    %cst_33 = arith.constant dense<0.000000e+00> : vector<8xf32>
    %87 = vector.multi_reduction <add>, %86, %cst_33 [1] : vector<8x8xf32> to vector<8xf32>
    %88 = vector.shape_cast %87 : vector<8xf32> to vector<8x1xf32>
    %89 = tpu.reciprocal %88 {approx = true} : vector<8x1xf32> -> vector<8x1xf32>
    %90 = vector.broadcast %89 : vector<8x1xf32> to vector<8x8xf32>
    %91 = arith.mulf %86, %90 : vector<8x8xf32>
    %92 = vector.extract_strided_slice %76 {offsets = [0, 0], sizes = [8, 8], strides = [1, 1]} : vector<8x32xf32> to vector<8x8xf32>
    %cst_34 = arith.constant dense<0.000000e+00> : vector<8x8xf32>
    %93 = tpu.matmul %91, %92, %cst_34 {dimension_numbers = #tpu.dot_dimension_numbers<[1], [0], [0], [1], [0, 0, 1, 1], [], []>} : vector<8x8xf32>, vector<8x8xf32>, vector<8x8xf32> -> vector<8x8xf32>
    %94 = vector.extract_strided_slice %74 {offsets = [0, 8], sizes = [8, 8], strides = [1, 1]} : vector<8x32xf32> to vector<8x8xf32>
    %95 = vector.extract_strided_slice %75 {offsets = [0, 8], sizes = [8, 8], strides = [1, 1]} : vector<8x32xf32> to vector<8x8xf32>
    %96 = tpu.transpose %95, [1, 0] : vector<8x8xf32> -> vector<8x8xf32>
    %cst_35 = arith.constant dense<0.000000e+00> : vector<8x8xf32>
    %97 = tpu.matmul %94, %96, %cst_35 {dimension_numbers = #tpu.dot_dimension_numbers<[1], [0], [0], [1], [0, 0, 1, 1], [], []>} : vector<8x8xf32>, vector<8x8xf32>, vector<8x8xf32> -> vector<8x8xf32>
    %98 = arith.addf %97, %36 : vector<8x8xf32>
    %cst_36 = arith.constant dense<0xFF800000> : vector<8xf32>
    %99 = vector.multi_reduction <maximumf>, %98, %cst_36 [1] : vector<8x8xf32> to vector<8xf32>
    %100 = vector.shape_cast %99 : vector<8xf32> to vector<8x1xf32>
    %101 = vector.broadcast %100 : vector<8x1xf32> to vector<8x8xf32>
    %102 = arith.subf %98, %101 : vector<8x8xf32>
    %103 = math.exp %102 : vector<8x8xf32>
    %cst_37 = arith.constant dense<0.000000e+00> : vector<8xf32>
    %104 = vector.multi_reduction <add>, %103, %cst_37 [1] : vector<8x8xf32> to vector<8xf32>
    %105 = vector.shape_cast %104 : vector<8xf32> to vector<8x1xf32>
    %106 = tpu.reciprocal %105 {approx = true} : vector<8x1xf32> -> vector<8x1xf32>
    %107 = vector.broadcast %106 : vector<8x1xf32> to vector<8x8xf32>
    %108 = arith.mulf %103, %107 : vector<8x8xf32>
    %109 = vector.extract_strided_slice %76 {offsets = [0, 8], sizes = [8, 8], strides = [1, 1]} : vector<8x32xf32> to vector<8x8xf32>
    %cst_38 = arith.constant dense<0.000000e+00> : vector<8x8xf32>
    %110 = tpu.matmul %108, %109, %cst_38 {dimension_numbers = #tpu.dot_dimension_numbers<[1], [0], [0], [1], [0, 0, 1, 1], [], []>} : vector<8x8xf32>, vector<8x8xf32>, vector<8x8xf32> -> vector<8x8xf32>
    %111 = vector.extract_strided_slice %74 {offsets = [0, 16], sizes = [8, 8], strides = [1, 1]} : vector<8x32xf32> to vector<8x8xf32>
    %112 = vector.extract_strided_slice %75 {offsets = [0, 16], sizes = [8, 8], strides = [1, 1]} : vector<8x32xf32> to vector<8x8xf32>
    %113 = tpu.transpose %112, [1, 0] : vector<8x8xf32> -> vector<8x8xf32>
    %cst_39 = arith.constant dense<0.000000e+00> : vector<8x8xf32>
    %114 = tpu.matmul %111, %113, %cst_39 {dimension_numbers = #tpu.dot_dimension_numbers<[1], [0], [0], [1], [0, 0, 1, 1], [], []>} : vector<8x8xf32>, vector<8x8xf32>, vector<8x8xf32> -> vector<8x8xf32>
    %115 = arith.addf %114, %36 : vector<8x8xf32>
    %cst_40 = arith.constant dense<0xFF800000> : vector<8xf32>
    %116 = vector.multi_reduction <maximumf>, %115, %cst_40 [1] : vector<8x8xf32> to vector<8xf32>
    %117 = vector.shape_cast %116 : vector<8xf32> to vector<8x1xf32>
    %118 = vector.broadcast %117 : vector<8x1xf32> to vector<8x8xf32>
    %119 = arith.subf %115, %118 : vector<8x8xf32>
    %120 = math.exp %119 : vector<8x8xf32>
    %cst_41 = arith.constant dense<0.000000e+00> : vector<8xf32>
    %121 = vector.multi_reduction <add>, %120, %cst_41 [1] : vector<8x8xf32> to vector<8xf32>
    %122 = vector.shape_cast %121 : vector<8xf32> to vector<8x1xf32>
    %123 = tpu.reciprocal %122 {approx = true} : vector<8x1xf32> -> vector<8x1xf32>
    %124 = vector.broadcast %123 : vector<8x1xf32> to vector<8x8xf32>
    %125 = arith.mulf %120, %124 : vector<8x8xf32>
    %126 = vector.extract_strided_slice %76 {offsets = [0, 16], sizes = [8, 8], strides = [1, 1]} : vector<8x32xf32> to vector<8x8xf32>
    %cst_42 = arith.constant dense<0.000000e+00> : vector<8x8xf32>
    %127 = tpu.matmul %125, %126, %cst_42 {dimension_numbers = #tpu.dot_dimension_numbers<[1], [0], [0], [1], [0, 0, 1, 1], [], []>} : vector<8x8xf32>, vector<8x8xf32>, vector<8x8xf32> -> vector<8x8xf32>
    %128 = vector.extract_strided_slice %74 {offsets = [0, 24], sizes = [8, 8], strides = [1, 1]} : vector<8x32xf32> to vector<8x8xf32>
    %129 = vector.extract_strided_slice %75 {offsets = [0, 24], sizes = [8, 8], strides = [1, 1]} : vector<8x32xf32> to vector<8x8xf32>
    %130 = tpu.transpose %129, [1, 0] : vector<8x8xf32> -> vector<8x8xf32>
    %cst_43 = arith.constant dense<0.000000e+00> : vector<8x8xf32>
    %131 = tpu.matmul %128, %130, %cst_43 {dimension_numbers = #tpu.dot_dimension_numbers<[1], [0], [0], [1], [0, 0, 1, 1], [], []>} : vector<8x8xf32>, vector<8x8xf32>, vector<8x8xf32> -> vector<8x8xf32>
    %132 = arith.addf %131, %36 : vector<8x8xf32>
    %cst_44 = arith.constant dense<0xFF800000> : vector<8xf32>
    %133 = vector.multi_reduction <maximumf>, %132, %cst_44 [1] : vector<8x8xf32> to vector<8xf32>
    %134 = vector.shape_cast %133 : vector<8xf32> to vector<8x1xf32>
    %135 = vector.broadcast %134 : vector<8x1xf32> to vector<8x8xf32>
    %136 = arith.subf %132, %135 : vector<8x8xf32>
    %137 = math.exp %136 : vector<8x8xf32>
    %cst_45 = arith.constant dense<0.000000e+00> : vector<8xf32>
    %138 = vector.multi_reduction <add>, %137, %cst_45 [1] : vector<8x8xf32> to vector<8xf32>
    %139 = vector.shape_cast %138 : vector<8xf32> to vector<8x1xf32>
    %140 = tpu.reciprocal %139 {approx = true} : vector<8x1xf32> -> vector<8x1xf32>
    %141 = vector.broadcast %140 : vector<8x1xf32> to vector<8x8xf32>
    %142 = arith.mulf %137, %141 : vector<8x8xf32>
    %143 = vector.extract_strided_slice %76 {offsets = [0, 24], sizes = [8, 8], strides = [1, 1]} : vector<8x32xf32> to vector<8x8xf32>
    %cst_46 = arith.constant dense<0.000000e+00> : vector<8x8xf32>
    %144 = tpu.matmul %142, %143, %cst_46 {dimension_numbers = #tpu.dot_dimension_numbers<[1], [0], [0], [1], [0, 0, 1, 1], [], []>} : vector<8x8xf32>, vector<8x8xf32>, vector<8x8xf32> -> vector<8x8xf32>
    %145 = tpu.concatenate %93, %110, %127, %144 in 1 : vector<8x8xf32>, vector<8x8xf32>, vector<8x8xf32>, vector<8x8xf32> -> vector<8x32xf32>
    %146 = vector.extract_strided_slice %38 {offsets = [0, 96], sizes = [32, 32], strides = [1, 1]} : vector<32x128xf32> to vector<32x32xf32>
    %cst_47 = arith.constant dense<0.000000e+00> : vector<8x32xf32>
    %147 = tpu.matmul %145, %146, %cst_47 {dimension_numbers = #tpu.dot_dimension_numbers<[1], [0], [0], [1], [0, 0, 1, 1], [], []>} : vector<8x32xf32>, vector<32x32xf32>, vector<8x32xf32> -> vector<8x32xf32>
    %148 = vector.extract_strided_slice %40 {offsets = [0, 96], sizes = [1, 32], strides = [1, 1]} : vector<1x128xf32> to vector<1x32xf32>
    %149 = vector.broadcast %148 : vector<1x32xf32> to vector<8x32xf32>
    %150 = arith.addf %147, %149 : vector<8x32xf32>
    %151 = arith.addf %30, %150 : vector<8x32xf32>
    %152 = vector.extract_strided_slice %42 {offsets = [2, 0], sizes = [1, 32], strides = [1, 1]} : vector<4x32xf32> to vector<1x32xf32>
    %153 = vector.extract_strided_slice %42 {offsets = [3, 0], sizes = [1, 32], strides = [1, 1]} : vector<4x32xf32> to vector<1x32xf32>
    %cst_48 = arith.constant dense<0.000000e+00> : vector<8xf32>
    %154 = vector.multi_reduction <add>, %151, %cst_48 [1] : vector<8x32xf32> to vector<8xf32>
    %155 = vector.shape_cast %154 : vector<8xf32> to vector<8x1xf32>
    %cst_49 = arith.constant 3.200000e+01 : f32
    %156 = vector.broadcast %cst_49 : f32 to vector<8x1xf32>
    %157 = arith.divf %155, %156 : vector<8x1xf32>
    %158 = vector.broadcast %157 : vector<8x1xf32> to vector<8x32xf32>
    %159 = arith.subf %151, %158 : vector<8x32xf32>
    %160 = arith.mulf %159, %159 : vector<8x32xf32>
    %cst_50 = arith.constant dense<0.000000e+00> : vector<8xf32>
    %161 = vector.multi_reduction <add>, %160, %cst_50 [1] : vector<8x32xf32> to vector<8xf32>
    %162 = vector.shape_cast %161 : vector<8xf32> to vector<8x1xf32>
    %cst_51 = arith.constant 3.200000e+01 : f32
    %163 = vector.broadcast %cst_51 : f32 to vector<8x1xf32>
    %164 = arith.divf %162, %163 : vector<8x1xf32>
    %165 = vector.broadcast %157 : vector<8x1xf32> to vector<8x32xf32>
    %166 = arith.subf %151, %165 : vector<8x32xf32>
    %cst_52 = arith.constant 9.99999974E-6 : f32
    %167 = vector.broadcast %cst_52 : f32 to vector<8x1xf32>
    %168 = arith.addf %164, %167 : vector<8x1xf32>
    %169 = math.rsqrt %168 : vector<8x1xf32>
    %170 = vector.broadcast %169 : vector<8x1xf32> to vector<8x32xf32>
    %171 = arith.mulf %166, %170 : vector<8x32xf32>
    %172 = vector.broadcast %152 : vector<1x32xf32> to vector<8x32xf32>
    %173 = arith.mulf %171, %172 : vector<8x32xf32>
    %174 = vector.broadcast %153 : vector<1x32xf32> to vector<8x32xf32>
    %175 = arith.addf %173, %174 : vector<8x32xf32>
    %c0_53 = arith.constant 0 : index
    %c0_54 = arith.constant 0 : index
    %c0_55 = arith.constant 0 : index
    %176 = vector.load %arg8[%c0_53, %c0_54, %c0_55] : memref<2x32x64xf32, #tpu.memory_space<vmem>>, vector<1x32x64xf32>
    %177 = vector.shape_cast %176 : vector<1x32x64xf32> to vector<32x64xf32>
    %cst_56 = arith.constant dense<0.000000e+00> : vector<8x64xf32>
    %178 = tpu.matmul %175, %177, %cst_56 {dimension_numbers = #tpu.dot_dimension_numbers<[1], [0], [0], [1], [0, 0, 1, 1], [], []>} : vector<8x32xf32>, vector<32x64xf32>, vector<8x64xf32> -> vector<8x64xf32>
    %c0_57 = arith.constant 0 : index
    %c0_58 = arith.constant 0 : index
    %c0_59 = arith.constant 0 : index
    %179 = vector.load %arg9[%c0_57, %c0_58, %c0_59] : memref<2x1x64xf32, #tpu.memory_space<vmem>>, vector<1x1x64xf32>
    %180 = vector.shape_cast %179 : vector<1x1x64xf32> to vector<1x64xf32>
    %181 = vector.broadcast %180 : vector<1x64xf32> to vector<8x64xf32>
    %182 = arith.addf %178, %181 : vector<8x64xf32>
    %cst_60 = arith.constant 1.702000e+00 : f32
    %183 = vector.broadcast %cst_60 : f32 to vector<8x64xf32>
    %184 = arith.mulf %183, %182 : vector<8x64xf32>
    %185 = arith.negf %184 : vector<8x64xf32>
    %186 = math.exp %185 : vector<8x64xf32>
    %cst_61 = arith.constant 1.000000e+00 : f32
    %187 = vector.broadcast %cst_61 : f32 to vector<8x64xf32>
    %188 = arith.addf %187, %186 : vector<8x64xf32>
    %189 = arith.divf %187, %188 : vector<8x64xf32>
    %190 = arith.mulf %182, %189 : vector<8x64xf32>
    %c0_62 = arith.constant 0 : index
    %c0_63 = arith.constant 0 : index
    %c0_64 = arith.constant 0 : index
    %191 = vector.load %arg10[%c0_62, %c0_63, %c0_64] : memref<2x64x32xf32, #tpu.memory_space<vmem>>, vector<1x64x32xf32>
    %192 = vector.shape_cast %191 : vector<1x64x32xf32> to vector<64x32xf32>
    %cst_65 = arith.constant dense<0.000000e+00> : vector<8x32xf32>
    %193 = tpu.matmul %190, %192, %cst_65 {dimension_numbers = #tpu.dot_dimension_numbers<[1], [0], [0], [1], [0, 0, 1, 1], [], []>} : vector<8x64xf32>, vector<64x32xf32>, vector<8x32xf32> -> vector<8x32xf32>
    %194 = arith.addf %151, %193 : vector<8x32xf32>
    %c0_66 = arith.constant 0 : index
    %c0_67 = arith.constant 0 : index
    %c0_68 = arith.constant 0 : index
    %195 = vector.load %arg11[%c0_66, %c0_67, %c0_68] : memref<2x1x32xf32, #tpu.memory_space<vmem>>, vector<1x1x32xf32>
    %196 = vector.shape_cast %195 : vector<1x1x32xf32> to vector<1x32xf32>
    %197 = vector.broadcast %196 : vector<1x32xf32> to vector<8x32xf32>
    %198 = arith.addf %194, %197 : vector<8x32xf32>
    %c1 = arith.constant 1 : index
    %c0_69 = arith.constant 0 : index
    %c0_70 = arith.constant 0 : index
    %199 = vector.load %arg5[%c1, %c0_69, %c0_70] : memref<2x32x128xf32, #tpu.memory_space<vmem>>, vector<1x32x128xf32>
    %200 = vector.shape_cast %199 : vector<1x32x128xf32> to vector<32x128xf32>
    %c1_71 = arith.constant 1 : index
    %c0_72 = arith.constant 0 : index
    %c0_73 = arith.constant 0 : index
    %201 = vector.load %arg6[%c1_71, %c0_72, %c0_73] : memref<2x1x128xf32, #tpu.memory_space<vmem>>, vector<1x1x128xf32>
    %202 = vector.shape_cast %201 : vector<1x1x128xf32> to vector<1x128xf32>
    %c1_74 = arith.constant 1 : index
    %c0_75 = arith.constant 0 : index
    %c0_76 = arith.constant 0 : index
    %203 = vector.load %arg7[%c1_74, %c0_75, %c0_76] : memref<2x4x32xf32, #tpu.memory_space<vmem>>, vector<1x4x32xf32>
    %204 = vector.shape_cast %203 : vector<1x4x32xf32> to vector<4x32xf32>
    %205 = vector.extract_strided_slice %204 {offsets = [0, 0], sizes = [1, 32], strides = [1, 1]} : vector<4x32xf32> to vector<1x32xf32>
    %206 = vector.extract_strided_slice %204 {offsets = [1, 0], sizes = [1, 32], strides = [1, 1]} : vector<4x32xf32> to vector<1x32xf32>
    %cst_77 = arith.constant dense<0.000000e+00> : vector<8xf32>
    %207 = vector.multi_reduction <add>, %198, %cst_77 [1] : vector<8x32xf32> to vector<8xf32>
    %208 = vector.shape_cast %207 : vector<8xf32> to vector<8x1xf32>
    %cst_78 = arith.constant 3.200000e+01 : f32
    %209 = vector.broadcast %cst_78 : f32 to vector<8x1xf32>
    %210 = arith.divf %208, %209 : vector<8x1xf32>
    %211 = vector.broadcast %210 : vector<8x1xf32> to vector<8x32xf32>
    %212 = arith.subf %198, %211 : vector<8x32xf32>
    %213 = arith.mulf %212, %212 : vector<8x32xf32>
    %cst_79 = arith.constant dense<0.000000e+00> : vector<8xf32>
    %214 = vector.multi_reduction <add>, %213, %cst_79 [1] : vector<8x32xf32> to vector<8xf32>
    %215 = vector.shape_cast %214 : vector<8xf32> to vector<8x1xf32>
    %cst_80 = arith.constant 3.200000e+01 : f32
    %216 = vector.broadcast %cst_80 : f32 to vector<8x1xf32>
    %217 = arith.divf %215, %216 : vector<8x1xf32>
    %218 = vector.broadcast %210 : vector<8x1xf32> to vector<8x32xf32>
    %219 = arith.subf %198, %218 : vector<8x32xf32>
    %cst_81 = arith.constant 9.99999974E-6 : f32
    %220 = vector.broadcast %cst_81 : f32 to vector<8x1xf32>
    %221 = arith.addf %217, %220 : vector<8x1xf32>
    %222 = math.rsqrt %221 : vector<8x1xf32>
    %223 = vector.broadcast %222 : vector<8x1xf32> to vector<8x32xf32>
    %224 = arith.mulf %219, %223 : vector<8x32xf32>
    %225 = vector.broadcast %205 : vector<1x32xf32> to vector<8x32xf32>
    %226 = arith.mulf %224, %225 : vector<8x32xf32>
    %227 = vector.broadcast %206 : vector<1x32xf32> to vector<8x32xf32>
    %228 = arith.addf %226, %227 : vector<8x32xf32>
    %229 = vector.extract_strided_slice %200 {offsets = [0, 0], sizes = [32, 96], strides = [1, 1]} : vector<32x128xf32> to vector<32x96xf32>
    %cst_82 = arith.constant dense<0.000000e+00> : vector<8x96xf32>
    %230 = tpu.matmul %228, %229, %cst_82 {dimension_numbers = #tpu.dot_dimension_numbers<[1], [0], [0], [1], [0, 0, 1, 1], [], []>} : vector<8x32xf32>, vector<32x96xf32>, vector<8x96xf32> -> vector<8x96xf32>
    %231 = vector.extract_strided_slice %202 {offsets = [0, 0], sizes = [1, 96], strides = [1, 1]} : vector<1x128xf32> to vector<1x96xf32>
    %232 = vector.broadcast %231 : vector<1x96xf32> to vector<8x96xf32>
    %233 = arith.addf %230, %232 : vector<8x96xf32>
    %234 = vector.extract_strided_slice %233 {offsets = [0, 0], sizes = [8, 32], strides = [1, 1]} : vector<8x96xf32> to vector<8x32xf32>
    %cst_83 = arith.constant 0.353553385 : f32
    %235 = vector.broadcast %cst_83 : f32 to vector<8x32xf32>
    %236 = arith.mulf %234, %235 : vector<8x32xf32>
    %237 = vector.extract_strided_slice %233 {offsets = [0, 32], sizes = [8, 32], strides = [1, 1]} : vector<8x96xf32> to vector<8x32xf32>
    %238 = vector.extract_strided_slice %233 {offsets = [0, 64], sizes = [8, 32], strides = [1, 1]} : vector<8x96xf32> to vector<8x32xf32>
    %239 = vector.extract_strided_slice %236 {offsets = [0, 0], sizes = [8, 8], strides = [1, 1]} : vector<8x32xf32> to vector<8x8xf32>
    %240 = vector.extract_strided_slice %237 {offsets = [0, 0], sizes = [8, 8], strides = [1, 1]} : vector<8x32xf32> to vector<8x8xf32>
    %241 = tpu.transpose %240, [1, 0] : vector<8x8xf32> -> vector<8x8xf32>
    %cst_84 = arith.constant dense<0.000000e+00> : vector<8x8xf32>
    %242 = tpu.matmul %239, %241, %cst_84 {dimension_numbers = #tpu.dot_dimension_numbers<[1], [0], [0], [1], [0, 0, 1, 1], [], []>} : vector<8x8xf32>, vector<8x8xf32>, vector<8x8xf32> -> vector<8x8xf32>
    %243 = arith.addf %242, %36 : vector<8x8xf32>
    %cst_85 = arith.constant dense<0xFF800000> : vector<8xf32>
    %244 = vector.multi_reduction <maximumf>, %243, %cst_85 [1] : vector<8x8xf32> to vector<8xf32>
    %245 = vector.shape_cast %244 : vector<8xf32> to vector<8x1xf32>
    %246 = vector.broadcast %245 : vector<8x1xf32> to vector<8x8xf32>
    %247 = arith.subf %243, %246 : vector<8x8xf32>
    %248 = math.exp %247 : vector<8x8xf32>
    %cst_86 = arith.constant dense<0.000000e+00> : vector<8xf32>
    %249 = vector.multi_reduction <add>, %248, %cst_86 [1] : vector<8x8xf32> to vector<8xf32>
    %250 = vector.shape_cast %249 : vector<8xf32> to vector<8x1xf32>
    %251 = tpu.reciprocal %250 {approx = true} : vector<8x1xf32> -> vector<8x1xf32>
    %252 = vector.broadcast %251 : vector<8x1xf32> to vector<8x8xf32>
    %253 = arith.mulf %248, %252 : vector<8x8xf32>
    %254 = vector.extract_strided_slice %238 {offsets = [0, 0], sizes = [8, 8], strides = [1, 1]} : vector<8x32xf32> to vector<8x8xf32>
    %cst_87 = arith.constant dense<0.000000e+00> : vector<8x8xf32>
    %255 = tpu.matmul %253, %254, %cst_87 {dimension_numbers = #tpu.dot_dimension_numbers<[1], [0], [0], [1], [0, 0, 1, 1], [], []>} : vector<8x8xf32>, vector<8x8xf32>, vector<8x8xf32> -> vector<8x8xf32>
    %256 = vector.extract_strided_slice %236 {offsets = [0, 8], sizes = [8, 8], strides = [1, 1]} : vector<8x32xf32> to vector<8x8xf32>
    %257 = vector.extract_strided_slice %237 {offsets = [0, 8], sizes = [8, 8], strides = [1, 1]} : vector<8x32xf32> to vector<8x8xf32>
    %258 = tpu.transpose %257, [1, 0] : vector<8x8xf32> -> vector<8x8xf32>
    %cst_88 = arith.constant dense<0.000000e+00> : vector<8x8xf32>
    %259 = tpu.matmul %256, %258, %cst_88 {dimension_numbers = #tpu.dot_dimension_numbers<[1], [0], [0], [1], [0, 0, 1, 1], [], []>} : vector<8x8xf32>, vector<8x8xf32>, vector<8x8xf32> -> vector<8x8xf32>
    %260 = arith.addf %259, %36 : vector<8x8xf32>
    %cst_89 = arith.constant dense<0xFF800000> : vector<8xf32>
    %261 = vector.multi_reduction <maximumf>, %260, %cst_89 [1] : vector<8x8xf32> to vector<8xf32>
    %262 = vector.shape_cast %261 : vector<8xf32> to vector<8x1xf32>
    %263 = vector.broadcast %262 : vector<8x1xf32> to vector<8x8xf32>
    %264 = arith.subf %260, %263 : vector<8x8xf32>
    %265 = math.exp %264 : vector<8x8xf32>
    %cst_90 = arith.constant dense<0.000000e+00> : vector<8xf32>
    %266 = vector.multi_reduction <add>, %265, %cst_90 [1] : vector<8x8xf32> to vector<8xf32>
    %267 = vector.shape_cast %266 : vector<8xf32> to vector<8x1xf32>
    %268 = tpu.reciprocal %267 {approx = true} : vector<8x1xf32> -> vector<8x1xf32>
    %269 = vector.broadcast %268 : vector<8x1xf32> to vector<8x8xf32>
    %270 = arith.mulf %265, %269 : vector<8x8xf32>
    %271 = vector.extract_strided_slice %238 {offsets = [0, 8], sizes = [8, 8], strides = [1, 1]} : vector<8x32xf32> to vector<8x8xf32>
    %cst_91 = arith.constant dense<0.000000e+00> : vector<8x8xf32>
    %272 = tpu.matmul %270, %271, %cst_91 {dimension_numbers = #tpu.dot_dimension_numbers<[1], [0], [0], [1], [0, 0, 1, 1], [], []>} : vector<8x8xf32>, vector<8x8xf32>, vector<8x8xf32> -> vector<8x8xf32>
    %273 = vector.extract_strided_slice %236 {offsets = [0, 16], sizes = [8, 8], strides = [1, 1]} : vector<8x32xf32> to vector<8x8xf32>
    %274 = vector.extract_strided_slice %237 {offsets = [0, 16], sizes = [8, 8], strides = [1, 1]} : vector<8x32xf32> to vector<8x8xf32>
    %275 = tpu.transpose %274, [1, 0] : vector<8x8xf32> -> vector<8x8xf32>
    %cst_92 = arith.constant dense<0.000000e+00> : vector<8x8xf32>
    %276 = tpu.matmul %273, %275, %cst_92 {dimension_numbers = #tpu.dot_dimension_numbers<[1], [0], [0], [1], [0, 0, 1, 1], [], []>} : vector<8x8xf32>, vector<8x8xf32>, vector<8x8xf32> -> vector<8x8xf32>
    %277 = arith.addf %276, %36 : vector<8x8xf32>
    %cst_93 = arith.constant dense<0xFF800000> : vector<8xf32>
    %278 = vector.multi_reduction <maximumf>, %277, %cst_93 [1] : vector<8x8xf32> to vector<8xf32>
    %279 = vector.shape_cast %278 : vector<8xf32> to vector<8x1xf32>
    %280 = vector.broadcast %279 : vector<8x1xf32> to vector<8x8xf32>
    %281 = arith.subf %277, %280 : vector<8x8xf32>
    %282 = math.exp %281 : vector<8x8xf32>
    %cst_94 = arith.constant dense<0.000000e+00> : vector<8xf32>
    %283 = vector.multi_reduction <add>, %282, %cst_94 [1] : vector<8x8xf32> to vector<8xf32>
    %284 = vector.shape_cast %283 : vector<8xf32> to vector<8x1xf32>
    %285 = tpu.reciprocal %284 {approx = true} : vector<8x1xf32> -> vector<8x1xf32>
    %286 = vector.broadcast %285 : vector<8x1xf32> to vector<8x8xf32>
    %287 = arith.mulf %282, %286 : vector<8x8xf32>
    %288 = vector.extract_strided_slice %238 {offsets = [0, 16], sizes = [8, 8], strides = [1, 1]} : vector<8x32xf32> to vector<8x8xf32>
    %cst_95 = arith.constant dense<0.000000e+00> : vector<8x8xf32>
    %289 = tpu.matmul %287, %288, %cst_95 {dimension_numbers = #tpu.dot_dimension_numbers<[1], [0], [0], [1], [0, 0, 1, 1], [], []>} : vector<8x8xf32>, vector<8x8xf32>, vector<8x8xf32> -> vector<8x8xf32>
    %290 = vector.extract_strided_slice %236 {offsets = [0, 24], sizes = [8, 8], strides = [1, 1]} : vector<8x32xf32> to vector<8x8xf32>
    %291 = vector.extract_strided_slice %237 {offsets = [0, 24], sizes = [8, 8], strides = [1, 1]} : vector<8x32xf32> to vector<8x8xf32>
    %292 = tpu.transpose %291, [1, 0] : vector<8x8xf32> -> vector<8x8xf32>
    %cst_96 = arith.constant dense<0.000000e+00> : vector<8x8xf32>
    %293 = tpu.matmul %290, %292, %cst_96 {dimension_numbers = #tpu.dot_dimension_numbers<[1], [0], [0], [1], [0, 0, 1, 1], [], []>} : vector<8x8xf32>, vector<8x8xf32>, vector<8x8xf32> -> vector<8x8xf32>
    %294 = arith.addf %293, %36 : vector<8x8xf32>
    %cst_97 = arith.constant dense<0xFF800000> : vector<8xf32>
    %295 = vector.multi_reduction <maximumf>, %294, %cst_97 [1] : vector<8x8xf32> to vector<8xf32>
    %296 = vector.shape_cast %295 : vector<8xf32> to vector<8x1xf32>
    %297 = vector.broadcast %296 : vector<8x1xf32> to vector<8x8xf32>
    %298 = arith.subf %294, %297 : vector<8x8xf32>
    %299 = math.exp %298 : vector<8x8xf32>
    %cst_98 = arith.constant dense<0.000000e+00> : vector<8xf32>
    %300 = vector.multi_reduction <add>, %299, %cst_98 [1] : vector<8x8xf32> to vector<8xf32>
    %301 = vector.shape_cast %300 : vector<8xf32> to vector<8x1xf32>
    %302 = tpu.reciprocal %301 {approx = true} : vector<8x1xf32> -> vector<8x1xf32>
    %303 = vector.broadcast %302 : vector<8x1xf32> to vector<8x8xf32>
    %304 = arith.mulf %299, %303 : vector<8x8xf32>
    %305 = vector.extract_strided_slice %238 {offsets = [0, 24], sizes = [8, 8], strides = [1, 1]} : vector<8x32xf32> to vector<8x8xf32>
    %cst_99 = arith.constant dense<0.000000e+00> : vector<8x8xf32>
    %306 = tpu.matmul %304, %305, %cst_99 {dimension_numbers = #tpu.dot_dimension_numbers<[1], [0], [0], [1], [0, 0, 1, 1], [], []>} : vector<8x8xf32>, vector<8x8xf32>, vector<8x8xf32> -> vector<8x8xf32>
    %307 = tpu.concatenate %255, %272, %289, %306 in 1 : vector<8x8xf32>, vector<8x8xf32>, vector<8x8xf32>, vector<8x8xf32> -> vector<8x32xf32>
    %308 = vector.extract_strided_slice %200 {offsets = [0, 96], sizes = [32, 32], strides = [1, 1]} : vector<32x128xf32> to vector<32x32xf32>
    %cst_100 = arith.constant dense<0.000000e+00> : vector<8x32xf32>
    %309 = tpu.matmul %307, %308, %cst_100 {dimension_numbers = #tpu.dot_dimension_numbers<[1], [0], [0], [1], [0, 0, 1, 1], [], []>} : vector<8x32xf32>, vector<32x32xf32>, vector<8x32xf32> -> vector<8x32xf32>
    %310 = vector.extract_strided_slice %202 {offsets = [0, 96], sizes = [1, 32], strides = [1, 1]} : vector<1x128xf32> to vector<1x32xf32>
    %311 = vector.broadcast %310 : vector<1x32xf32> to vector<8x32xf32>
    %312 = arith.addf %309, %311 : vector<8x32xf32>
    %313 = arith.addf %198, %312 : vector<8x32xf32>
    %314 = vector.extract_strided_slice %204 {offsets = [2, 0], sizes = [1, 32], strides = [1, 1]} : vector<4x32xf32> to vector<1x32xf32>
    %315 = vector.extract_strided_slice %204 {offsets = [3, 0], sizes = [1, 32], strides = [1, 1]} : vector<4x32xf32> to vector<1x32xf32>
    %cst_101 = arith.constant dense<0.000000e+00> : vector<8xf32>
    %316 = vector.multi_reduction <add>, %313, %cst_101 [1] : vector<8x32xf32> to vector<8xf32>
    %317 = vector.shape_cast %316 : vector<8xf32> to vector<8x1xf32>
    %cst_102 = arith.constant 3.200000e+01 : f32
    %318 = vector.broadcast %cst_102 : f32 to vector<8x1xf32>
    %319 = arith.divf %317, %318 : vector<8x1xf32>
    %320 = vector.broadcast %319 : vector<8x1xf32> to vector<8x32xf32>
    %321 = arith.subf %313, %320 : vector<8x32xf32>
    %322 = arith.mulf %321, %321 : vector<8x32xf32>
    %cst_103 = arith.constant dense<0.000000e+00> : vector<8xf32>
    %323 = vector.multi_reduction <add>, %322, %cst_103 [1] : vector<8x32xf32> to vector<8xf32>
    %324 = vector.shape_cast %323 : vector<8xf32> to vector<8x1xf32>
    %cst_104 = arith.constant 3.200000e+01 : f32
    %325 = vector.broadcast %cst_104 : f32 to vector<8x1xf32>
    %326 = arith.divf %324, %325 : vector<8x1xf32>
    %327 = vector.broadcast %319 : vector<8x1xf32> to vector<8x32xf32>
    %328 = arith.subf %313, %327 : vector<8x32xf32>
    %cst_105 = arith.constant 9.99999974E-6 : f32
    %329 = vector.broadcast %cst_105 : f32 to vector<8x1xf32>
    %330 = arith.addf %326, %329 : vector<8x1xf32>
    %331 = math.rsqrt %330 : vector<8x1xf32>
    %332 = vector.broadcast %331 : vector<8x1xf32> to vector<8x32xf32>
    %333 = arith.mulf %328, %332 : vector<8x32xf32>
    %334 = vector.broadcast %314 : vector<1x32xf32> to vector<8x32xf32>
    %335 = arith.mulf %333, %334 : vector<8x32xf32>
    %336 = vector.broadcast %315 : vector<1x32xf32> to vector<8x32xf32>
    %337 = arith.addf %335, %336 : vector<8x32xf32>
    %c1_106 = arith.constant 1 : index
    %c0_107 = arith.constant 0 : index
    %c0_108 = arith.constant 0 : index
    %338 = vector.load %arg8[%c1_106, %c0_107, %c0_108] : memref<2x32x64xf32, #tpu.memory_space<vmem>>, vector<1x32x64xf32>
    %339 = vector.shape_cast %338 : vector<1x32x64xf32> to vector<32x64xf32>
    %cst_109 = arith.constant dense<0.000000e+00> : vector<8x64xf32>
    %340 = tpu.matmul %337, %339, %cst_109 {dimension_numbers = #tpu.dot_dimension_numbers<[1], [0], [0], [1], [0, 0, 1, 1], [], []>} : vector<8x32xf32>, vector<32x64xf32>, vector<8x64xf32> -> vector<8x64xf32>
    %c1_110 = arith.constant 1 : index
    %c0_111 = arith.constant 0 : index
    %c0_112 = arith.constant 0 : index
    %341 = vector.load %arg9[%c1_110, %c0_111, %c0_112] : memref<2x1x64xf32, #tpu.memory_space<vmem>>, vector<1x1x64xf32>
    %342 = vector.shape_cast %341 : vector<1x1x64xf32> to vector<1x64xf32>
    %343 = vector.broadcast %342 : vector<1x64xf32> to vector<8x64xf32>
    %344 = arith.addf %340, %343 : vector<8x64xf32>
    %cst_113 = arith.constant 1.702000e+00 : f32
    %345 = vector.broadcast %cst_113 : f32 to vector<8x64xf32>
    %346 = arith.mulf %345, %344 : vector<8x64xf32>
    %347 = arith.negf %346 : vector<8x64xf32>
    %348 = math.exp %347 : vector<8x64xf32>
    %cst_114 = arith.constant 1.000000e+00 : f32
    %349 = vector.broadcast %cst_114 : f32 to vector<8x64xf32>
    %350 = arith.addf %349, %348 : vector<8x64xf32>
    %351 = arith.divf %349, %350 : vector<8x64xf32>
    %352 = arith.mulf %344, %351 : vector<8x64xf32>
    %c1_115 = arith.constant 1 : index
    %c0_116 = arith.constant 0 : index
    %c0_117 = arith.constant 0 : index
    %353 = vector.load %arg10[%c1_115, %c0_116, %c0_117] : memref<2x64x32xf32, #tpu.memory_space<vmem>>, vector<1x64x32xf32>
    %354 = vector.shape_cast %353 : vector<1x64x32xf32> to vector<64x32xf32>
    %cst_118 = arith.constant dense<0.000000e+00> : vector<8x32xf32>
    %355 = tpu.matmul %352, %354, %cst_118 {dimension_numbers = #tpu.dot_dimension_numbers<[1], [0], [0], [1], [0, 0, 1, 1], [], []>} : vector<8x64xf32>, vector<64x32xf32>, vector<8x32xf32> -> vector<8x32xf32>
    %356 = arith.addf %313, %355 : vector<8x32xf32>
    %c1_119 = arith.constant 1 : index
    %c0_120 = arith.constant 0 : index
    %c0_121 = arith.constant 0 : index
    %357 = vector.load %arg11[%c1_119, %c0_120, %c0_121] : memref<2x1x32xf32, #tpu.memory_space<vmem>>, vector<1x1x32xf32>
    %358 = vector.shape_cast %357 : vector<1x1x32xf32> to vector<1x32xf32>
    %359 = vector.broadcast %358 : vector<1x32xf32> to vector<8x32xf32>
    %360 = arith.addf %356, %359 : vector<8x32xf32>
    %c0_122 = arith.constant 0 : index
    %c0_123 = arith.constant 0 : index
    %361 = vector.load %arg12[%c0_122, %c0_123] : memref<2x32xf32, #tpu.memory_space<vmem>>, vector<2x32xf32>
    %362 = vector.extract_strided_slice %360 {offsets = [0, 0], sizes = [1, 32], strides = [1, 1]} : vector<8x32xf32> to vector<1x32xf32>
    %363 = vector.extract_strided_slice %361 {offsets = [0, 0], sizes = [1, 32], strides = [1, 1]} : vector<2x32xf32> to vector<1x32xf32>
    %364 = vector.extract_strided_slice %361 {offsets = [1, 0], sizes = [1, 32], strides = [1, 1]} : vector<2x32xf32> to vector<1x32xf32>
    %cst_124 = arith.constant dense<0.000000e+00> : vector<1xf32>
    %365 = vector.multi_reduction <add>, %362, %cst_124 [1] : vector<1x32xf32> to vector<1xf32>
    %366 = vector.shape_cast %365 : vector<1xf32> to vector<1x1xf32>
    %cst_125 = arith.constant 3.200000e+01 : f32
    %367 = vector.broadcast %cst_125 : f32 to vector<1x1xf32>
    %368 = arith.divf %366, %367 : vector<1x1xf32>
    %369 = vector.broadcast %368 : vector<1x1xf32> to vector<1x32xf32>
    %370 = arith.subf %362, %369 : vector<1x32xf32>
    %371 = arith.mulf %370, %370 : vector<1x32xf32>
    %cst_126 = arith.constant dense<0.000000e+00> : vector<1xf32>
    %372 = vector.multi_reduction <add>, %371, %cst_126 [1] : vector<1x32xf32> to vector<1xf32>
    %373 = vector.shape_cast %372 : vector<1xf32> to vector<1x1xf32>
    %cst_127 = arith.constant 3.200000e+01 : f32
    %374 = vector.broadcast %cst_127 : f32 to vector<1x1xf32>
    %375 = arith.divf %373, %374 : vector<1x1xf32>
    %376 = vector.broadcast %368 : vector<1x1xf32> to vector<1x32xf32>
    %377 = arith.subf %362, %376 : vector<1x32xf32>
    %cst_128 = arith.constant 9.99999974E-6 : f32
    %378 = vector.broadcast %cst_128 : f32 to vector<1x1xf32>
    %379 = arith.addf %375, %378 : vector<1x1xf32>
    %380 = math.rsqrt %379 : vector<1x1xf32>
    %381 = vector.broadcast %380 : vector<1x1xf32> to vector<1x32xf32>
    %382 = arith.mulf %377, %381 : vector<1x32xf32>
    %383 = arith.mulf %382, %363 : vector<1x32xf32>
    %384 = arith.addf %383, %364 : vector<1x32xf32>
    %c0_129 = arith.constant 0 : index
    %c0_130 = arith.constant 0 : index
    %385 = vector.load %arg13[%c0_129, %c0_130] : memref<32x16xf32, #tpu.memory_space<vmem>>, vector<32x16xf32>
    %cst_131 = arith.constant dense<0.000000e+00> : vector<1x16xf32>
    %386 = tpu.matmul %384, %385, %cst_131 {dimension_numbers = #tpu.dot_dimension_numbers<[1], [0], [0], [1], [0, 0, 1, 1], [], []>} : vector<1x32xf32>, vector<32x16xf32>, vector<1x16xf32> -> vector<1x16xf32>
    %387 = arith.mulf %386, %386 : vector<1x16xf32>
    %cst_132 = arith.constant dense<0.000000e+00> : vector<1xf32>
    %388 = vector.multi_reduction <add>, %387, %cst_132 [1] : vector<1x16xf32> to vector<1xf32>
    %389 = vector.shape_cast %388 : vector<1xf32> to vector<1x1xf32>
    %cst_133 = arith.constant 9.99999996E-13 : f32
    %390 = vector.broadcast %cst_133 : f32 to vector<1x1xf32>
    %391 = arith.addf %389, %390 : vector<1x1xf32>
    %392 = math.rsqrt %391 : vector<1x1xf32>
    %393 = vector.broadcast %392 : vector<1x1xf32> to vector<1x16xf32>
    %394 = arith.mulf %386, %393 : vector<1x16xf32>
    %c0_134 = arith.constant 0 : index
    %c0_135 = arith.constant 0 : index
    %c0_136 = arith.constant 0 : index
    %395 = vector.load %arg14[%c0_134, %c0_135, %c0_136] : memref<1x1x16xf32, #tpu.memory_space<vmem>>, vector<1x1x16xf32>
    %396 = vector.shape_cast %395 : vector<1x1x16xf32> to vector<1x16xf32>
    %397 = vector.shape_cast %394 : vector<1x16xf32> to vector<1x1x16xf32>
    tpu.vector_store %arg14[%c0_134, %c0_135, %c0_136], %397 {strides = array<i32>} : memref<1x1x16xf32, #tpu.memory_space<vmem>>, vector<1x1x16xf32>,
    return
  }
  func.func @transform_0(%arg0: i32) -> (i32, i32, i32) {
    %c0_i32 = arith.constant 0 : i32
    %c0_i32_0 = arith.constant 0 : i32
    %c0_i32_1 = arith.constant 0 : i32
    return %arg0, %c0_i32, %c0_i32_0 : i32, i32, i32
  }
  func.func @transform_1(%arg0: i32) -> (i32, i32) {
    %c0_i32 = arith.constant 0 : i32
    %c0_i32_0 = arith.constant 0 : i32
    %c0_i32_1 = arith.constant 0 : i32
    return %c0_i32, %c0_i32_0 : i32, i32
  }
  func.func @transform_2(%arg0: i32) -> (i32, i32) {
    %c0_i32 = arith.constant 0 : i32
    %c0_i32_0 = arith.constant 0 : i32
    %c0_i32_1 = arith.constant 0 : i32
    return %c0_i32, %c0_i32_0 : i32, i32
  }
  func.func @transform_3(%arg0: i32) -> (i32, i32) {
    %c0_i32 = arith.constant 0 : i32
    %c0_i32_0 = arith.constant 0 : i32
    %c0_i32_1 = arith.constant 0 : i32
    return %c0_i32, %c0_i32_0 : i32, i32
  }
  func.func @transform_4(%arg0: i32) -> (i32, i32, i32) {
    %c0_i32 = arith.constant 0 : i32
    %c0_i32_0 = arith.constant 0 : i32
    %c0_i32_1 = arith.constant 0 : i32
    %c0_i32_2 = arith.constant 0 : i32
    return %c0_i32, %c0_i32_0, %c0_i32_1 : i32, i32, i32
  }
  func.func @transform_5(%arg0: i32) -> (i32, i32, i32) {
    %c0_i32 = arith.constant 0 : i32
    %c0_i32_0 = arith.constant 0 : i32
    %c0_i32_1 = arith.constant 0 : i32
    %c0_i32_2 = arith.constant 0 : i32
    return %c0_i32, %c0_i32_0, %c0_i32_1 : i32, i32, i32
  }
  func.func @transform_6(%arg0: i32) -> (i32, i32, i32) {
    %c0_i32 = arith.constant 0 : i32
    %c0_i32_0 = arith.constant 0 : i32
    %c0_i32_1 = arith.constant 0 : i32
    %c0_i32_2 = arith.constant 0 : i32
    return %c0_i32, %c0_i32_0, %c0_i32_1 : i32, i32, i32
  }
  func.func @transform_7(%arg0: i32) -> (i32, i32, i32) {
    %c0_i32 = arith.constant 0 : i32
    %c0_i32_0 = arith.constant 0 : i32
    %c0_i32_1 = arith.constant 0 : i32
    %c0_i32_2 = arith.constant 0 : i32
    return %c0_i32, %c0_i32_0, %c0_i32_1 : i32, i32, i32
  }
  func.func @transform_8(%arg0: i32) -> (i32, i32, i32) {
    %c0_i32 = arith.constant 0 : i32
    %c0_i32_0 = arith.constant 0 : i32
    %c0_i32_1 = arith.constant 0 : i32
    %c0_i32_2 = arith.constant 0 : i32
    return %c0_i32, %c0_i32_0, %c0_i32_1 : i32, i32, i32
  }
  func.func @transform_9(%arg0: i32) -> (i32, i32, i32) {
    %c0_i32 = arith.constant 0 : i32
    %c0_i32_0 = arith.constant 0 : i32
    %c0_i32_1 = arith.constant 0 : i32
    %c0_i32_2 = arith.constant 0 : i32
    return %c0_i32, %c0_i32_0, %c0_i32_1 : i32, i32, i32
  }
  func.func @transform_10(%arg0: i32) -> (i32, i32, i32) {
    %c0_i32 = arith.constant 0 : i32
    %c0_i32_0 = arith.constant 0 : i32
    %c0_i32_1 = arith.constant 0 : i32
    %c0_i32_2 = arith.constant 0 : i32
    return %c0_i32, %c0_i32_0, %c0_i32_1 : i32, i32, i32
  }
  func.func @transform_11(%arg0: i32) -> (i32, i32) {
    %c0_i32 = arith.constant 0 : i32
    %c0_i32_0 = arith.constant 0 : i32
    %c0_i32_1 = arith.constant 0 : i32
    return %c0_i32, %c0_i32_0 : i32, i32
  }
  func.func @transform_12(%arg0: i32) -> (i32, i32) {
    %c0_i32 = arith.constant 0 : i32
    %c0_i32_0 = arith.constant 0 : i32
    %c0_i32_1 = arith.constant 0 : i32
    return %c0_i32, %c0_i32_0 : i32, i32
  }
  func.func @transform_13(%arg0: i32) -> (i32, i32, i32) {
    %c0_i32 = arith.constant 0 : i32
    %c0_i32_0 = arith.constant 0 : i32
    %c0_i32_1 = arith.constant 0 : i32
    return %arg0, %c0_i32, %c0_i32_0 : i32, i32, i32
  }
}

</mosaic_0001>

<bundles_post_ra>
// kernel: tpu_custom_call.1
= control target key start
LH: loop header
LB: loop body
LE: loop exit
PB: predicated region body
PF: predicated region fallthrough
CT: control target
= control target key end

     0   :  { %18 = vsyncpa [#allocation3], 0  ;;  %s4318_s0 = inlined_call_operand.vmem [shape: f32[2,8,192], index: 0, kind: input, shape index: {}]   ;;  %s4319_s1 = inlined_call_operand.vmem [shape: f32[192,32], index: 1, kind: input, shape index: {}]   ;;  %s4320_s2 = inlined_call_operand.vmem [shape: f32[8,32], index: 2, kind: input, shape index: {}]   ;;  %s4321_s3 = inlined_call_operand.vmem [shape: f32[2,32], index: 3, kind: input, shape index: {}]   ;;  %s4322_s4 = inlined_call_operand.vmem [shape: f32[2,32,128], index: 4, kind: input, shape index: {}]   ;;  %s4323_s5 = inlined_call_operand.vmem [shape: f32[2,1,128], index: 5, kind: input, shape index: {}]   ;;  %s4324_s6 = inlined_call_operand.vmem [shape: f32[2,4,32], index: 6, kind: input, shape index: {}]   ;;  %s4325_s7 = inlined_call_operand.vmem [shape: f32[2,32,64], index: 7, kind: input, shape index: {}]   ;;  %s4326_s8 = inlined_call_operand.vmem [shape: f32[2,1,64], index: 8, kind: input, shape index: {}]   ;;  %s4327_s9 = inlined_call_operand.vmem [shape: f32[2,64,32], index: 9, kind: input, shape index: {}]   ;;  %s4328_s10 = inlined_call_operand.vmem [shape: f32[2,1,32], index: 10, kind: input, shape index: {}]   ;;  %s4329_s11 = inlined_call_operand.vmem [shape: f32[2,32], index: 11, kind: input, shape index: {}]   ;;  %s4330_s12 = inlined_call_operand.vmem [shape: f32[32,16], index: 12, kind: input, shape index: {}]   ;;  %s4331_s13 = inlined_call_operand.hbm [shape: f32[2,1,16], index: 13, kind: output, shape index: {}]  }
   0x1   :  { %20 = vsyncpa [#allocation3 + $0x1], 0  ;;  %s3657_s25 = smov 0   ;;  %s3659_s26 = smov 0  }
   0x2   :  { %s3661_s27 = smov 0   ;;  %s3663_s28 = smov 0  }
   0x3 LB: > { %4348 = sst [smem:[#allocation5_spill]] %s3561_s27  ;;  %s3678_s29 = sadd.s32 4294967295, %s3565_s28   ;;  %s3565_s28 = sphi %s3663_s28, %s4365_s28   ;;  %s3561_s27 = sphi %s3661_s27, %s4367_s27   ;;  %s3557_s26 = sphi %s3659_s26, %s4369_s26   ;;  %s3553_s25 = sphi %s3657_s25, %s4368_s25  }
   0x4   : > { %s2917_s30 = sadd.s32 4294967294, %s3565_s28   ;;  %s3682_s14 = sadd.s32 1, %s3565_s28  }
   0x5   : > { %4349 = sst [smem:[#allocation6_spill]] %s3682_s14  ;;  %s311_s15 = sadd.s32 1, %s3561_s27 }
   0x6   : > { %s308_s16 = ssub.s32 %s3565_s28, %s3682_s14  ;;  %p321_p0 = scmp.ne.s32.totalorder %s3561_s27, %s3557_s26 }
   0x7   : > { %p309_p1 = scmp.eq.s32.totalorder %s308_s16, 0  ;;  %p322_p2 = scmp.eq.s32.totalorder %s3678_s29, 1 }
   0x8   : > { %p327_p3 = scmp.ne.s32.totalorder %s3557_s26, %s3553_s25  ;;  %p328_p4 = scmp.eq.s32.totalorder %s2917_s30, 1 }
   0x9   : > { %s3693_s17 = scalar_select %p309_p1, %s3561_s27, %s311_s15  }
   0xa   : > { %p3695_p5 = por %p322_p2, %p321_p0  ;;  %p3699_p6 = por %p328_p4, %p327_p3 }
   0xb   : > { %4350 = sst [smem:[#allocation7_spill]] %s3693_s17  ;;  %p2920_p7 = scmp.ge.s32.totalorder %s3565_s28, 1 }
   0xc   : > { %p390_p8 = scmp.lt.s32.totalorder %s3565_s28, 3 }
   0xe   : > { %p391_p9 = pnand %p2920_p7, %p390_p8 }
   0xf   : > { %v440_v0 = vld [vmem:[%s4319_s1] sm:$0xff] (!%p391_p9)  ;;  %v441_v1 = vld [vmem:[%s4319_s1 + $0x8] sm:$0xff] (!%p391_p9)  ;;  %v442_v2 = vld [vmem:[%s4319_s1 + $0x10] sm:$0xff] (!%p391_p9)  ;;  %p433_p10 = scmp.lt.s32.totalorder (!%p391_p9), %s3678_s29, 1  ;;  %v3567_v3 = vmov (!%p391_p9), 0.0|0.0   ;;  %vm465_vm0 = vcmask (!%p391_p9), 523264   ;;  %v555_v51 = vlaneseq (!%p391_p9) }
  0x10   : > { %394 = sbr.rel (%p391_p9) target bundleno = 7929 (0x1ef9), region = 72  ;;  %3269 = vmatprep.subr.bf16.mxu0 (!%p391_p9), %v3567_v3  ;;  %v3270_v4 = vpack.c.bf16 (!%p391_p9), %v441_v1, %v440_v0  ;;  %v443_v5 = vld [vmem:[%s4319_s1 + $0x18] sm:$0xff] (!%p391_p9)  ;;  %3305 = vmatprep.subr.bf16.mxu1 (!%p391_p9), %v3567_v3  ;;  %v444_v7 = vld [vmem:[%s4319_s1 + $0x20] sm:$0xff] (!%p391_p9)  ;;  %v445_v8 = vld [vmem:[%s4319_s1 + $0x28] sm:$0xff] (!%p391_p9)  ;;  %vm540_vm1 = vcmask (!%p391_p9), 261120   ;;  %vm3568_vm2 = vmmov (!%p391_p9), 0  }
  0x11   : > { %v3273_v6 = vpack.c.bf16 (!%p391_p9), %v443_v5, %v442_v2  ;;  %v3276_v9 = vpack.c.bf16 (!%p391_p9), %v445_v8, %v444_v7  ;;  %v446_v10 = vld [vmem:[%s4319_s1 + $0x30] sm:$0xff] (!%p391_p9)  ;;  %v447_v11 = vld [vmem:[%s4319_s1 + $0x38] sm:$0xff] (!%p391_p9)  ;;  %v448_v14 = vld [vmem:[%s4319_s1 + $0x40] sm:$0xff] (!%p391_p9)  ;;  %v3807_v53 = vshrl.u32 (!%p391_p9), %v555_v51, 7  ;;  %s3571_s16 = smov (!%p391_p9), 88   ;;  %vm681_vm3 = vcmask (!%p391_p9), 64512  }
  0x12   : > { %3271 = vmatpush1.bf16.msra.mxu0 (!%p391_p9), %v3270_v4  ;;  %v3279_v13 = vpack.c.bf16 (!%p391_p9), %v447_v11, %v446_v10  ;;  %v449_v15 = vld [vmem:[%s4319_s1 + $0x48] sm:$0xff] (!%p391_p9)  ;;  %v450_v17 = vld [vmem:[%s4319_s1 + $0x50] sm:$0xff] (!%p391_p9)  ;;  %v451_v18 = vld [vmem:[%s4319_s1 + $0x58] sm:$0xff] (!%p391_p9)  ;;  %s4335_s21 = smov (!%p391_p9), 64   ;;  %s4346_s22 = smov (!%p391_p9), 120   ;;  %vm1352_vm5 = vcmask (!%p391_p9), 130048  }
  0x13   : > { %3272 = vmatprep.subr.bf16.mxu0 (!%p391_p9), %v3567_v3  ;;  %v3282_v16 = vpack.c.bf16 (!%p391_p9), %v449_v15, %v448_v14  ;;  %v3285_v19 = vpack.c.bf16 (!%p391_p9), %v451_v18, %v450_v17  ;;  %v452_v20 = vld [vmem:[%s4319_s1 + $0x60] sm:$0xff] (!%p391_p9)  ;;  %v453_v21 = vld [vmem:[%s4319_s1 + $0x68] sm:$0xff] (!%p391_p9)  ;;  %v454_v23 = vld [vmem:[%s4319_s1 + $0x70] sm:$0xff] (!%p391_p9)  ;;  %v3810_v54 = vsub.s32 (!%p391_p9), 0, %v3807_v53  ;;  %v3816_v56 = vsub.s32 (!%p391_p9), 1, %v3807_v53  ;;  %s4343_s27 = smov (!%p391_p9), 56  }
  0x14   : > { %v3288_v22 = vpack.c.bf16 (!%p391_p9), %v453_v21, %v452_v20  ;;  %v455_v24 = vld [vmem:[%s4319_s1 + $0x78] sm:$0xff] (!%p391_p9)  ;;  %v456_v26 = vld [vmem:[%s4319_s1 + $0x80] sm:$0xff] (!%p391_p9)  ;;  %v457_v27 = vld [vmem:[%s4319_s1 + $0x88] sm:$0xff] (!%p391_p9)  ;;  %s4345_s17 = smov (!%p391_p9), 112   ;;  %s3578_s23 = smov (!%p391_p9), 72   ;;  %vm1354_vm6 = vcmask (!%p391_p9), 195584  }
  0x15   : > { %v3291_v25 = vpack.c.bf16 (!%p391_p9), %v455_v24, %v454_v23  ;;  %v3294_v28 = vpack.c.bf16 (!%p391_p9), %v457_v27, %v456_v26  ;;  %v458_v29 = vld [vmem:[%s4319_s1 + $0x90] sm:$0xff] (!%p391_p9)  ;;  %v459_v30 = vld [vmem:[%s4319_s1 + $0x98] sm:$0xff] (!%p391_p9)  ;;  %v460_v32 = vld [vmem:[%s4319_s1 + $0xa0] sm:$0xff] (!%p391_p9)  ;;  %s4336_s14 = smov (!%p391_p9), 48   ;;  %s4342_s24 = smov (!%p391_p9), 40   ;;  %vm2744_vm7 = vcmask (!%p391_p9), 253952  }
  0x16   : > { %3274 = vmatpush1.bf16.msra.mxu0 (!%p391_p9), %v3273_v6  ;;  %v3297_v31 = vpack.c.bf16 (!%p391_p9), %v459_v30, %v458_v29  ;;  %v461_v33 = vld [vmem:[%s4319_s1 + $0xa8] sm:$0xff] (!%p391_p9)  ;;  %v462_v35 = vld [vmem:[%s4319_s1 + $0xb0] sm:$0xff] (!%p391_p9)  ;;  %v463_v36 = vld [vmem:[%s4319_s1 + $0xb8] sm:$0xff] (!%p391_p9)  ;;  %v566_v30 = vand.u32 (!%p391_p9), 127, %v555_v51  ;;  %vm2841_vm8 = vcmask (!%p391_p9), 122880  }
  0x17   : > { %s434_s20 = scalar_select %p433_p10, %s3678_s29, 1  ;;  %3275 = vmatprep.subr.bf16.mxu0 %v3567_v3  ;;  %v3300_v34 = vpack.c.bf16 %v461_v33, %v460_v32  ;;  %v3303_v37 = vpack.c.bf16 %v463_v36, %v462_v35  ;;  %v464_v39 = vld [vmem:[%s4320_s2] sm:$0xff]  ;;  %v3834_v7 = vld [vmem:[%s4322_s4 + $0x8] sm:$0xff]  ;;  %v3839_v8 = vld [vmem:[%s4322_s4 + $0x10] sm:$0xff] }
  0x18   : > { %v539_v55 = vld [vmem:[%s4321_s3] sm:$0x3]  ;;  %v3848_v11 = vld [vmem:[%s4322_s4 + $0x18] sm:$0xff]  ;;  %vm567_vm4 = vcmp.lt.s32.totalorder %v566_v30, 5 }
  0x19   : > { %s2988_s30 = sshll.u32 %s434_s20, 4  ;;  %v558_v57 = vrot.slane %v539_v55, %v3810_v54  ;;  %v563_v60 = vrot.slane %v539_v55, %v3816_v56  ;;  %v3829_v6 = vld [vmem:[%s4322_s4] sm:$0xff]  ;;  %s4347_s20 = smov 80  }
  0x1a   : > { %s3731_s15 = scalar_lea.vmem %s4318_s0, %s2988_s30  ;;  %3277 = vmatpush1.bf16.msra.mxu0 %v3276_v9  ;;  %v3429_v9 = vpack.i.bf16 %v3834_v7, %v3829_v6  ;;  %v3306_v10 = vpack.c.bf16 %v3834_v7, %v3829_v6  ;;  %v3861_v17 = vld [vmem:[%s4324_s6] sm:$0xf]  ;;  %s3570_s30 = smov 96  }
  0x1b   : > { %v439_v12 = vld [vmem:[%s3731_s15 + $0x8] sm:$0xff]  ;;  %3278 = vmatprep.subr.bf16.mxu0 %v3567_v3  ;;  %v438_v38 = vld [vmem:[%s3731_s15] sm:$0xff]  ;;  %v591_v18 = vrot.slane %v3861_v17, %v3810_v54  ;;  %v596_v21 = vrot.slane %v3861_v17, %v3816_v56  ;;  %s4344_s15 = smov 104  }
  0x1c   : > { %2923 = vmatprep.mubr.msk.f32.mxu0 %vm465_vm0, %v439_v12  ;;  %v3569_v12 = vmov 0.0   ;;  %3307 = vmatpush3.bf16.msra.mxu1 %v3306_v10  ;;  %v3873_v24 = vld [vmem:[%s4323_s5] ss:$0 sm:$0xff] }
  0x1d   : > { %3082 = vmatprep.mubr.msk.f32.mxu1 %vm3568_vm2, %v3569_v12  ;;  %3308 = vmatprep.subr.bf16.mxu1 %v3567_v3 }
  0x1e   : > { %3280 = vmatpush1.bf16.msra.mxu0 %v3279_v13  ;;  %v3309_v13 = vpack.c.bf16 %v3848_v11, %v3839_v8 }
  0x1f   : > { %3281 = vmatprep.subr.bf16.mxu0 %v3567_v3 }
  0x20   : > { %3310 = vmatpush3.bf16.msra.mxu1 %v3309_v13 }
  0x21   : > { %3085 = vmatprep.subr.mxu1 %v3569_v12 }
  0x22   : > { %3283 = vmatpush1.bf16.msra.mxu0 %v3282_v16 }
  0x23   : > { %3284 = vmatprep.subr.bf16.mxu0 %v3567_v3 }
  0x26   : > { %3286 = vmatpush1.bf16.msra.mxu0 %v3285_v19 }
  0x27   : > { %3287 = vmatprep.subr.bf16.mxu0 %v3567_v3 }
  0x2a   : > { %3289 = vmatpush1.bf16.msra.mxu0 %v3288_v22 }
  0x2b   : > { %3290 = vmatprep.subr.bf16.mxu0 %v3567_v3 }
  0x2e   : > { %3292 = vmatpush1.bf16.msra.mxu0 %v3291_v25 }
  0x2f   : > { %3293 = vmatprep.subr.bf16.mxu0 %v3567_v3 }
  0x32   : > { %3295 = vmatpush1.bf16.msra.mxu0 %v3294_v28 }
  0x33   : > { %3296 = vmatprep.subr.bf16.mxu0 %v3567_v3 }
  0x36   : > { %3298 = vmatpush1.bf16.msra.mxu0 %v3297_v31  ;;  %v3572_v31 = vmov -1e+30  }
  0x37   : > { %3299 = vmatprep.subr.bf16.mxu0 %v3567_v3  ;;  %v3892_v32 = vsel %vm567_vm4, 0.0, %v3572_v31 }
  0x3a   : > { %3301 = vmatpush1.bf16.msra.mxu0 %v3300_v34 }
  0x3b   : > { %3302 = vmatprep.subr.bf16.mxu0 %v3567_v3 }
  0x3e   : > { %3304 = vmatpush1.bf16.msra.mxu0 %v3303_v37 }
  0x3f   : > { %3317 = vmatprep.subr.bf16.mxu0 %v3567_v3 }
  0x41   : > { %534 = vmatmul.mubr.f32.vlgmr.msra.gmra.mrb[0].mxu0 %v438_v38 }
  0x42   : > { %3144 = vmatprep.mubr.msk.f32.mxu0 %vm3568_vm2, %v3569_v12 }
 0x114   : > { %v535_v40 = vpop.f32.mrb[0].mxu0 }
 0x115   : > { %v536_v41 = vadd.f32 %v535_v40, %v464_v39  ;;  %v537_v42 = vpop.f32.mrb[1].mxu0 }
 0x117   : > { %v541_v43 = vsel %vm540_vm1, %v536_v41, 0.0 }
 0x118   : > { %542 = vadd.xlane.f32.xlu0 %v541_v43 }
 0x1a5   : > { %v543_v44 = vpop.xlane.xlu0 %542 }
 0x1a6   : > { %v545_v45 = vmul.f32 0.03125, %v543_v44 }
 0x1a8   : > { %v546_v46 = vsub.f32 %v536_v41, %v545_v45 }
 0x1aa   : > { %v547_v47 = vmul.f32 %v546_v46, %v546_v46 }
 0x1ac   : > { %v548_v48 = vsel %vm540_vm1, %v547_v47, 0.0 }
 0x1ad   : > { %549 = vadd.xlane.f32.xlu0 %v548_v48 }
 0x23a   : > { %v550_v49 = vpop.xlane.xlu0 %549 }
 0x23b   : > { %v551_v50 = vmul.f32 0.03125, %v550_v49 }
 0x23d   : > { %v552_v52 = vadd.f32 1e-05, %v551_v50 }
 0x23f   : > { %3449 = vrsqrt.f32 %v552_v52 }
 0x249   : > { %v3450_v58 = vpop.eup %3449 }
 0x24a   : > { %v554_v59 = vmul.f32 %v3450_v58, %v546_v46 }
 0x24c   : > { %v559_v61 = vmul.f32 %v558_v57, %v554_v59 }
 0x24e   : > { %v3820_v62 = vadd.f32 %v563_v60, %v559_v61 }
 0x250   : > { %v575_v63 = vsel %vm540_vm1, %v3820_v62, 0.0 }
 0x251   : > { %576 = vadd.xlane.f32.xlu1 %v575_v63 }
 0x2de   : > { %v577_v0 = vpop.xlane.xlu1 %576 }
 0x2df   : > { %v578_v1 = vmul.f32 0.03125, %v577_v0 }
 0x2e1   : > { %v579_v2 = vsub.f32 %v3820_v62, %v578_v1 }
 0x2e3   : > { %v580_v4 = vmul.f32 %v579_v2, %v579_v2 }
 0x2e5   : > { %v581_v5 = vsel %vm540_vm1, %v580_v4, 0.0 }
 0x2e6   : > { %582 = vadd.xlane.f32.xlu1 %v581_v5 }
 0x373   : > { %v583_v14 = vpop.xlane.xlu1 %582 }
 0x374   : > { %v584_v15 = vmul.f32 0.03125, %v583_v14 }
 0x376   : > { %v585_v16 = vadd.f32 1e-05, %v584_v15 }
 0x378   : > { %3451 = vrsqrt.f32 %v585_v16 }
 0x382   : > { %v3452_v19 = vpop.eup %3451 }
 0x383   : > { %v587_v20 = vmul.f32 %v3452_v19, %v579_v2 }
 0x385   : > { %v592_v22 = vmul.f32 %v591_v18, %v587_v20 }
 0x387   : > { %v597_v23 = vadd.f32 %v596_v21, %v592_v22 }
 0x389   : > { %3083 = vmatmul.mubr.msk.f32.vlgmr.msra.gmra.mrb[0].mxu1 %vm540_vm1, %v597_v23 }
 0x38a   : > { %3087 = vmatprep.mubr.msk.f32.mxu1 %vm3568_vm2, %v3569_v12 }
 0x45c   : > { %v673_v25 = vpop.f32.mrb[0].mxu1 }
 0x45d   : > { %v3876_v26 = vadd.f32 %v3873_v24, %v673_v25  ;;  %v3084_v27 = vpop.f32.mrb[1].mxu1 }
 0x45f   : > { %679 = vrot.lane.b32.xlu0 %v3876_v26, %s3570_s30  ;;  %v3884_v29 = vmul.f32 0.35355338, %v3876_v26 }
 0x463   : > { %846 = vrot.lane.b32.xlu0 %v3876_v26, %s3571_s16 }
 0x4d1   : > { %v680_v28 = vpop.permute.xlu0 %679 }
 0x4d2   : > { %3086 = vmatpush3.xpose.msk.msra.mxu1 %vm681_vm3, %v680_v28 }
 0x4d3   : > { %3090 = vmatprep.subr.mxu1 %v3569_v12 }
 0x4d5   : > { %3088 = vmatmul.mubr.msk.f32.vlgmr.msra.gmra.mrb[2].mxu1 %vm681_vm3, %v3884_v29  ;;  %v847_v46 = vpop.permute.xlu0 %846 }
 0x4d6   : > { %3092 = vmatprep.mubr.msk.f32.mxu1 %vm3568_vm2, %v3569_v12 }
 0x5a8   : > { %v753_v33 = vpop.f32.mrb[2].mxu1 }
 0x5a9   : > { %v754_v34 = vadd.f32 %v753_v33, %v3892_v32  ;;  %v3089_v35 = vpop.f32.mrb[3].mxu1 }
 0x5ab   : > { %v757_v36 = vsel %vm681_vm3, %v754_v34, -inf }
 0x5ac   : > { %758 = vmax.xlane.f32.xlu1 %v757_v36 }
 0x5bd   : > { %768 = vrot.lane.b32.xlu1 %v3876_v26, %s4335_s21  ;;  %s4340_s21 = smov 32  }
 0x639   : > { %v759_v37 = vpop.xlane.xlu1 %758 }
 0x63a   : > { %v760_v38 = vsub.f32 %v754_v34, %v759_v37 }
 0x63c   : > { %v761_v39 = vmul.f32 1.442695, %v760_v38 }
 0x63d   : > { %v769_v40 = vpop.permute.xlu1 %768 }
 0x63e   : > { %3453 = vpow2.f32 %v761_v39  ;;  %3091 = vmatpush3.msra.mxu1 %v769_v40  ;;  %v3434_v39 = vpack.i.bf16 %v3848_v11, %v3839_v8 }
 0x63f   : > { %3095 = vmatprep.subr.mxu1 %v3569_v12 }
 0x648   : > { %v3454_v41 = vpop.eup %3453 }
 0x649   : > { %v763_v42 = vsel %vm681_vm3, %v3454_v41, 0.0 }
 0x64a   : > { %764 = vadd.xlane.f32.xlu1 %v763_v42 }
 0x65b   : > { %844 = vrot.lane.b32.xlu1 %v3884_v29, %s4346_s22  ;;  %s4354_s22 = smov 120  }
 0x6d7   : > { %v765_v43 = vpop.xlane.xlu1 %764 }
 0x6d8   : > { %3455 = vrcp.f32 %v765_v43 }
 0x6db   : > { %v845_v47 = vpop.permute.xlu1 %844 }
 0x6e2   : > { %v3456_v44 = vpop.eup %3455 }
 0x6e3   : > { %v767_v45 = vmul.f32 %v3456_v44, %v3454_v41 }
 0x6e5   : > { %3093 = vmatmul.mubr.msk.f32.vlgmr.msra.gmra.mrb[4].mxu1 %vm681_vm3, %v767_v45 }
 0x6e6   : > { %3096 = vmatpush3.xpose.msk.msra.mxu1 %vm681_vm3, %v847_v46  ;;  %3097 = vmatprep.mubr.msk.f32.mxu1 %vm3568_vm2, %v3569_v12 }
 0x6e7   : > { %3100 = vmatprep.subr.mxu1 %v3569_v12 }
 0x6e9   : > { %3098 = vmatmul.mubr.msk.f32.vlgmr.msra.gmra.mrb[6].mxu1 %vm681_vm3, %v845_v47 }
 0x6ea   : > { %3102 = vmatprep.mubr.msk.f32.mxu1 %vm3568_vm2, %v3569_v12 }
 0x7b8   : > { %v3910_v48 = vpop.f32.mrb[4].mxu1 }
 0x7b9   : > { %v3094_v49 = vpop.f32.mrb[5].mxu1 }
 0x7bc   : > { %v918_v50 = vpop.f32.mrb[6].mxu1 }
 0x7bd   : > { %v919_v51 = vadd.f32 %v918_v50, %v3892_v32  ;;  %v3099_v52 = vpop.f32.mrb[7].mxu1 }
 0x7bf   : > { %v922_v55 = vsel %vm681_vm3, %v919_v51, -inf }
 0x7c0   : > { %923 = vmax.xlane.f32.xlu0 %v922_v55 }
 0x7d6   : > { %933 = vrot.lane.b32.xlu0 %v3876_v26, %s4343_s27  ;;  %s4355_s27 = smov 112  }
 0x7da   : > { %1009 = vrot.lane.b32.xlu0 %v3884_v29, %s4345_s17  ;;  %s4356_s17 = smov 104  }
 0x84d   : > { %v924_v57 = vpop.xlane.xlu0 %923 }
 0x84e   : > { %v925_v58 = vsub.f32 %v919_v51, %v924_v57 }
 0x850   : > { %v926_v59 = vmul.f32 1.442695, %v925_v58 }
 0x851   : > { %v934_v60 = vpop.permute.xlu0 %933 }
 0x852   : > { %3457 = vpow2.f32 %v926_v59  ;;  %3101 = vmatpush3.msra.mxu1 %v934_v60 }
 0x853   : > { %3105 = vmatprep.subr.mxu1 %v3569_v12 }
 0x855   : > { %v1010_v5 = vpop.permute.xlu0 %1009 }
 0x85c   : > { %v3458_v61 = vpop.eup %3457 }
 0x85d   : > { %v928_v63 = vsel %vm681_vm3, %v3458_v61, 0.0 }
 0x85e   : > { %929 = vadd.xlane.f32.xlu1 %v928_v63 }
 0x86f   : > { %1011 = vrot.lane.b32.xlu1 %v3876_v26, %s4347_s20  ;;  %s4360_s20 = smov 40  }
 0x8eb   : > { %v930_v0 = vpop.xlane.xlu1 %929 }
 0x8ec   : > { %3459 = vrcp.f32 %v930_v0 }
 0x8ef   : > { %v1012_v4 = vpop.permute.xlu1 %1011 }
 0x8f6   : > { %v3460_v1 = vpop.eup %3459 }
 0x8f7   : > { %v932_v2 = vmul.f32 %v3460_v1, %v3458_v61 }
 0x8f9   : > { %3103 = vmatmul.mubr.msk.f32.vlgmr.msra.gmra.mrb[8].mxu1 %vm681_vm3, %v932_v2 }
 0x8fa   : > { %3106 = vmatpush3.xpose.msk.msra.mxu1 %vm681_vm3, %v1012_v4  ;;  %3107 = vmatprep.mubr.msk.f32.mxu1 %vm3568_vm2, %v3569_v12 }
 0x8fb   : > { %3110 = vmatprep.subr.mxu1 %v3569_v12 }
 0x8fd   : > { %3108 = vmatmul.mubr.msk.f32.vlgmr.msra.gmra.mrb[10].mxu1 %vm681_vm3, %v1010_v5 }
 0x8fe   : > { %3112 = vmatprep.mubr.msk.f32.mxu1 %vm3568_vm2, %v3569_v12 }
 0x9cc   : > { %v1005_v10 = vpop.f32.mrb[8].mxu1 }
 0x9cd   : > { %v3104_v13 = vpop.f32.mrb[9].mxu1 }
 0x9d0   : > { %v1083_v14 = vpop.f32.mrb[10].mxu1 }
 0x9d1   : > { %v1084_v15 = vadd.f32 %v1083_v14, %v3892_v32  ;;  %v3109_v16 = vpop.f32.mrb[11].mxu1 }
 0x9d2   : > { %v1472_v16 = vld [vmem:[%s4325_s7] sm:$0xff] }
 0x9d3   : > { %v1087_v18 = vsel %vm681_vm3, %v1084_v15, -inf }
 0x9d4   : > { %1088 = vmax.xlane.f32.xlu1 %v1087_v18 }
 0x9e5   : > { %1176 = vrot.lane.b32.xlu1 %v3876_v26, %s3578_s23 }
 0x9e9   : > { %1174 = vrot.lane.b32.xlu1 %v3884_v29, %s4344_s15  ;;  %s4361_s15 = smov 32  }
 0xa61   : > { %v1089_v19 = vpop.xlane.xlu1 %1088 }
 0xa62   : > { %v1090_v20 = vsub.f32 %v1084_v15, %v1089_v19  ;;  %v1474_v19 = vld [vmem:[%s4325_s7 + $0x10] sm:$0xff] }
 0xa64   : > { %v1091_v21 = vmul.f32 1.442695, %v1090_v20  ;;  %v1475_v20 = vld [vmem:[%s4325_s7 + $0x18] sm:$0xff] }
 0xa65   : > { %v1177_v29 = vpop.permute.xlu1 %1176 }
 0xa66   : > { %3461 = vpow2.f32 %v1091_v21  ;;  %v3321_v21 = vpack.c.bf16 %v1475_v20, %v1474_v19 }
 0xa69   : > { %v1175_v31 = vpop.permute.xlu1 %1174 }
 0xa70   : > { %v3462_v22 = vpop.eup %3461 }
 0xa71   : > { %v1093_v23 = vsel %vm681_vm3, %v3462_v22, 0.0 }
 0xa72   : > { %1094 = vadd.xlane.f32.xlu0 %v1093_v23 }
 0xa88   : > { %1098 = vrot.lane.b32.xlu0 %v3876_v26, %s4336_s14  ;;  %s4337_s14 = smov 16  }
 0xaff   : > { %v1095_v25 = vpop.xlane.xlu0 %1094 }
 0xb00   : > { %3463 = vrcp.f32 %v1095_v25 }
 0xb03   : > { %v1099_v27 = vpop.permute.xlu0 %1098 }
 0xb04   : > { %3111 = vmatpush3.msra.mxu1 %v1099_v27  ;;  %v1464_v27 = vsub.s32 2, %v3807_v53 }
 0xb05   : > { %3115 = vmatprep.subr.mxu1 %v3569_v12 }
 0xb0a   : > { %v3464_v28 = vpop.eup %3463 }
 0xb0b   : > { %v1097_v30 = vmul.f32 %v3464_v28, %v3462_v22  ;;  %v1469_v28 = vsub.s32 3, %v3807_v53  ;;  %v2975_v53 = vld [vmem:[%s4327_s9 + $0x50] sm:$0xff] }
 0xb0d   : > { %3113 = vmatmul.mubr.msk.f32.vlgmr.msra.gmra.mrb[12].mxu1 %vm681_vm3, %v1097_v30 }
 0xb0e   : > { %3116 = vmatpush3.xpose.msk.msra.mxu1 %vm681_vm3, %v1177_v29  ;;  %3117 = vmatprep.mubr.msk.f32.mxu1 %vm3568_vm2, %v3569_v12  ;;  %v1465_v29 = vrot.slane %v3861_v17, %v1464_v27 }
 0xb0f   : > { %3120 = vmatprep.subr.mxu1 %v3569_v12 }
 0xb11   : > { %3118 = vmatmul.mubr.msk.f32.vlgmr.msra.gmra.mrb[14].mxu1 %vm681_vm3, %v1175_v31 }
 0xb12   : > { %3122 = vmatprep.mubr.msk.f32.mxu1 %vm3568_vm2, %v3569_v12 }
 0xbe0   : > { %v1170_v33 = vpop.f32.mrb[12].mxu1 }
 0xbe1   : > { %v3114_v34 = vpop.f32.mrb[13].mxu1 }
 0xbe4   : > { %v1248_v35 = vpop.f32.mrb[14].mxu1 }
 0xbe5   : > { %v1249_v36 = vadd.f32 %v1248_v35, %v3892_v32  ;;  %v3119_v37 = vpop.f32.mrb[15].mxu1 }
 0xbe6   : > { %v1565_v37 = vld [vmem:[%s4327_s9 + $0x8] sm:$0xff] }
 0xbe7   : > { %v1252_v38 = vsel %vm681_vm3, %v1249_v36, -inf }
 0xbe8   : > { %1253 = vmax.xlane.f32.xlu0 %v1252_v38 }
 0xbfe   : > { %1263 = vrot.lane.b32.xlu0 %v3876_v26, %s4342_s24  ;;  %s4363_s24 = smov 16  }
 0xc02   : > { %3435 = vrot.lane.b32.xlu0 %v3434_v39, %s4340_s21  ;;  %v1567_v39 = vld [vmem:[%s4327_s9 + $0x18] sm:$0xff] }
 0xc06   : > { %1344 = vrot.lane.b32.xlu0 %v1170_v33, %s4337_s14  ;;  %s4338_s14 = smov 8   ;;  %v1470_v33 = vrot.slane %v3861_v17, %v1469_v28  ;;  %v1566_v17 = vld [vmem:[%s4327_s9 + $0x10] sm:$0xff] }
 0xc0a   : > { %1372 = vrot.lane.b32.xlu0 %v3873_v24, %s4340_s21 }
 0xc75   : > { %v1254_v40 = vpop.xlane.xlu0 %1253 }
 0xc76   : > { %v1255_v41 = vsub.f32 %v1249_v36, %v1254_v40  ;;  %v1564_v36 = vld [vmem:[%s4327_s9] sm:$0xff]  ;;  %v3327_v40 = vpack.c.bf16 %v1567_v39, %v1566_v17 }
 0xc77   : > { %v3324_v38 = vpack.c.bf16 %v1565_v37, %v1564_v36 }
 0xc78   : > { %v1256_v42 = vmul.f32 1.442695, %v1255_v41  ;;  %v1568_v41 = vld [vmem:[%s4327_s9 + $0x20] sm:$0xff] }
 0xc79   : > { %v1264_v43 = vpop.permute.xlu0 %1263 }
 0xc7a   : > { %3465 = vpow2.f32 %v1256_v42  ;;  %3121 = vmatpush3.msra.mxu1 %v1264_v43  ;;  %v1569_v42 = vld [vmem:[%s4327_s9 + $0x28] sm:$0xff] }
 0xc7b   : > { %3311 = vmatprep.subr.bf16.mxu1 %v3567_v3  ;;  %v3330_v43 = vpack.c.bf16 %v1569_v42, %v1568_v41 }
 0xc7d   : > { %v3436_v46 = vpop.permute.xlu0 %3435 }
 0xc7e   : > { %v3438_v49 = vunpack.i.h.bf16 %v3436_v46  ;;  %v3437_v50 = vunpack.i.l.bf16 %v3436_v46 }
 0xc80   : > { %v3315_v55 = vpack.c.bf16 %v3438_v49, %v3437_v50 }
 0xc81   : > { %v1345_v58 = vpop.permute.xlu0 %1344 }
 0xc84   : > { %v3466_v26 = vpop.eup %3465 }
 0xc85   : > { %v1258_v8 = vsel %vm681_vm3, %v3466_v26, 0.0  ;;  %v1373_v63 = vpop.permute.xlu0 %1372 }
 0xc86   : > { %1259 = vadd.xlane.f32.xlu1 %v1258_v8  ;;  %v1571_v8 = vld [vmem:[%s4327_s9 + $0x38] sm:$0xff] }
 0xc97   : > { %3430 = vrot.lane.b32.xlu1 %v3429_v9, %s4340_s21  ;;  %s4353_s21 = smov 80  }
 0xc9b   : > { %1340 = vrot.lane.b32.xlu1 %v1005_v10, %s4338_s14  ;;  %s4339_s14 = smov 24  }
 0xd13   : > { %v1260_v11 = vpop.xlane.xlu1 %1259 }
 0xd14   : > { %3467 = vrcp.f32 %v1260_v11 }
 0xd17   : > { %v3431_v24 = vpop.permute.xlu1 %3430 }
 0xd18   : > { %v3433_v44 = vunpack.i.h.bf16 %v3431_v24  ;;  %v3432_v45 = vunpack.i.l.bf16 %v3431_v24  ;;  %v2939_v24 = vld [vmem:[%s4326_s8] ss:$0 sm:$0xff] }
 0xd1a   : > { %v3312_v51 = vpack.c.bf16 %v3433_v44, %v3432_v45 }
 0xd1b   : > { %v1341_v9 = vpop.permute.xlu1 %1340 }
 0xd1c   : > { %v1351_v57 = vsel %vm681_vm3, %v3910_v48, %v1341_v9 }
 0xd1d   : > { %v1353_v59 = vsel %vm1352_vm5, %v1351_v57, %v1345_v58 }
 0xd1e   : > { %v3468_v47 = vpop.eup %3467 }
 0xd1f   : > { %v1262_v52 = vmul.f32 %v3468_v47, %v3466_v26  ;;  %v1570_v26 = vld [vmem:[%s4327_s9 + $0x30] sm:$0xff] }
 0xd20   : > { %v3333_v11 = vpack.c.bf16 %v1571_v8, %v1570_v26 }
 0xd21   : > { %3123 = vmatmul.mubr.msk.f32.vlgmr.msra.gmra.mrb[16].mxu1 %vm681_vm3, %v1262_v52 }
 0xd22   : > { %3313 = vmatpush3.bf16.msra.mxu1 %v3312_v51  ;;  %3133 = vmatprep.mubr.msk.f32.mxu1 %vm3568_vm2, %v3569_v12 }
 0xd23   : > { %3314 = vmatprep.subr.bf16.mxu1 %v3567_v3 }
 0xd26   : > { %3316 = vmatpush3.bf16.msra.mxu1 %v3315_v55 }
 0xd27   : > { %3323 = vmatprep.subr.bf16.mxu1 %v3567_v3 }
 0xdf4   : > { %v1335_v6 = vpop.f32.mrb[16].mxu1 }
 0xdf5   : > { %1348 = vrot.lane.b32.xlu1 %v1335_v6, %s4339_s14  ;;  %v3124_v7 = vpop.f32.mrb[17].mxu1  ;;  %s4362_s14 = smov 8  }
 0xdf6   : > { %v2943_v7 = vld [vmem:[%s4328_s10] ss:$0 sm:$0xff] }
 0xe67   : > { %v1349_v60 = vpop.permute.xlu1 %1348 }
 0xe68   : > { %v1355_v61 = vsel %vm1354_vm6, %v1353_v59, %v1349_v60 }
 0xe69   : > { %3134 = vmatmul.mubr.msk.f32.vlgmr.msra.gmra.mrb[18].mxu1 %vm540_vm1, %v1355_v61 }
 0xe6a   : > { %3163 = vmatprep.mubr.msk.f32.mxu1 %vm3568_vm2, %v3569_v12  ;;  %3325 = vmatpush3.bf16.msra.mxu1 %v3324_v38 }
 0xe6b   : > { %3326 = vmatprep.subr.bf16.mxu1 %v3567_v3 }
 0xe6e   : > { %3328 = vmatpush3.bf16.msra.mxu1 %v3327_v40 }
 0xe6f   : > { %3329 = vmatprep.subr.bf16.mxu1 %v3567_v3 }
 0xe72   : > { %3331 = vmatpush3.bf16.msra.mxu1 %v3330_v43 }
 0xe73   : > { %3332 = vmatprep.subr.bf16.mxu1 %v3567_v3 }
 0xe76   : > { %3334 = vmatpush3.bf16.msra.mxu1 %v3333_v11 }
 0xe77   : > { %3177 = vmatprep.subr.mxu1 %v3569_v12 }
 0xf3c   : > { %v1444_v0 = vpop.f32.mrb[18].mxu1 }
 0xf3d   : > { %v1445_v1 = vadd.f32 %v1444_v0, %v1373_v63  ;;  %v3135_v2 = vpop.f32.mrb[19].mxu1 }
 0xf3e   : > { %v4057_v2 = vld [vmem:[%s4322_s4 + $0x20] sm:$0xff] }
 0xf3f   : > { %v3979_v4 = vadd.f32 %v1445_v1, %v3820_v62  ;;  %v1473_v62 = vld [vmem:[%s4325_s7 + $0x8] sm:$0xff] }
 0xf40   : > { %v3318_v18 = vpack.c.bf16 %v1473_v62, %v1472_v16  ;;  %v4083_v62 = vld [vmem:[%s4324_s6 + $0x4] sm:$0xf] }
 0xf41   : > { %v1449_v48 = vsel %vm540_vm1, %v3979_v4, 0.0 }
 0xf42   : > { %1450 = vadd.xlane.f32.xlu1 %v1449_v48  ;;  %3319 = vmatpush3.bf16.msra.mxu0 %v3318_v18  ;;  %v1679_v18 = vrot.slane %v4083_v62, %v3810_v54 }
 0xf43   : > { %3320 = vmatprep.subr.bf16.mxu0 %v3567_v3 }
 0xf46   : > { %3322 = vmatpush3.bf16.msra.mxu0 %v3321_v21  ;;  %v1684_v21 = vrot.slane %v4083_v62, %v3816_v56 }
 0xf47   : > { %3335 = vmatprep.subr.bf16.mxu0 %v3567_v3 }
 0xfcf   : > { %v1451_v5 = vpop.xlane.xlu1 %1450 }
 0xfd0   : > { %v1452_v10 = vmul.f32 0.03125, %v1451_v5  ;;  %v4069_v5 = vld [vmem:[%s4322_s4 + $0x30] sm:$0xff] }
 0xfd2   : > { %v1453_v13 = vsub.f32 %v3979_v4, %v1452_v10  ;;  %v4074_v10 = vld [vmem:[%s4322_s4 + $0x38] sm:$0xff] }
 0xfd4   : > { %v1454_v14 = vmul.f32 %v1453_v13, %v1453_v13 }
 0xfd6   : > { %v1455_v15 = vsel %vm540_vm1, %v1454_v14, 0.0 }
 0xfd7   : > { %1456 = vadd.xlane.f32.xlu0 %v1455_v15 }
0x1064   : > { %v1457_v22 = vpop.xlane.xlu0 %1456 }
0x1065   : > { %v1458_v23 = vmul.f32 0.03125, %v1457_v22 }
0x1067   : > { %v1459_v25 = vadd.f32 1e-05, %v1458_v23 }
0x1069   : > { %3469 = vrsqrt.f32 %v1459_v25  ;;  %v4095_v25 = vld [vmem:[%s4323_s5 + $0x1] ss:$0 sm:$0xff] }
0x1073   : > { %v3470_v30 = vpop.eup %3469 }
0x1074   : > { %v1461_v31 = vmul.f32 %v3470_v30, %v1453_v13  ;;  %v3339_v13 = vpack.c.bf16 %v4074_v10, %v4069_v5 }
0x1076   : > { %v1466_v34 = vmul.f32 %v1465_v29, %v1461_v31 }
0x1078   : > { %v1471_v35 = vadd.f32 %v1470_v33, %v1466_v34 }
0x107a   : > { %3145 = vmatmul.mubr.msk.f32.vlgmr.msra.gmra.mrb[2].mxu0 %vm540_vm1, %v1471_v35 }
0x107b   : > { %3174 = vmatprep.mubr.msk.f32.mxu0 %vm3568_vm2, %v3569_v12 }
0x114d   : > { %v1552_v44 = vpop.f32.mrb[2].mxu0 }
0x114e   : > { %v1553_v45 = vadd.f32 %v2939_v24, %v1552_v44  ;;  %v3146_v46 = vpop.f32.mrb[3].mxu0 }
0x1150   : > { %v2941_v47 = vmul.f32 -1.702, %v1553_v45 }
0x1152   : > { %v1558_v49 = vmul.f32 1.442695, %v2941_v47 }
0x1154   : > { %3471 = vpow2.f32 %v1558_v49 }
0x115e   : > { %v3472_v50 = vpop.eup %3471 }
0x115f   : > { %v1560_v51 = vadd.f32 1.0, %v3472_v50 }
0x1161   : > { %3473 = vrcp.f32 %v1560_v51 }
0x116b   : > { %v3474_v52 = vpop.eup %3473 }
0x116c   : > { %v1563_v55 = vmul.f32 %v3474_v52, %v1553_v45 }
0x116e   : > { %3164 = vmatmul.mubr.msk.f32.vlgmr.msra.gmra.mrb[20].mxu1 %vm465_vm0, %v1563_v55 }
0x116f   : > { %3179 = vmatprep.mubr.msk.f32.mxu1 %vm3568_vm2, %v3569_v12 }
0x1241   : > { %v1641_v6 = vpop.f32.mrb[20].mxu1 }
0x1242   : > { %v1645_v9 = vadd.f32 %v1641_v6, %v3979_v4  ;;  %v3165_v57 = vpop.f32.mrb[21].mxu1  ;;  %v4062_v4 = vld [vmem:[%s4322_s4 + $0x28] sm:$0xff] }
0x1243   : > { %v3336_v48 = vpack.c.bf16 %v4062_v4, %v4057_v2 }
0x1244   : > { %v4048_v58 = vadd.f32 %v2943_v7, %v1645_v9 }
0x1245   : > { %3337 = vmatpush3.bf16.msra.mxu0 %v3336_v48 }
0x1246   : > { %v1663_v59 = vsel %vm540_vm1, %v4048_v58, 0.0  ;;  %3338 = vmatprep.subr.bf16.mxu0 %v3567_v3 }
0x1247   : > { %1664 = vadd.xlane.f32.xlu0 %v1663_v59 }
0x1249   : > { %3340 = vmatpush3.bf16.msra.mxu0 %v3339_v13 }
0x124a   : > { %3187 = vmatprep.subr.mxu0 %v3569_v12 }
0x12d4   : > { %v1665_v60 = vpop.xlane.xlu0 %1664 }
0x12d5   : > { %v1666_v61 = vmul.f32 0.03125, %v1665_v60 }
0x12d7   : > { %v1667_v63 = vsub.f32 %v4048_v58, %v1666_v61 }
0x12d9   : > { %v1668_v0 = vmul.f32 %v1667_v63, %v1667_v63 }
0x12db   : > { %v1669_v1 = vsel %vm540_vm1, %v1668_v0, 0.0 }
0x12dc   : > { %1670 = vadd.xlane.f32.xlu0 %v1669_v1 }
0x1369   : > { %v1671_v14 = vpop.xlane.xlu0 %1670 }
0x136a   : > { %v1672_v15 = vmul.f32 0.03125, %v1671_v14 }
0x136c   : > { %v1673_v16 = vadd.f32 1e-05, %v1672_v15 }
0x136e   : > { %3475 = vrsqrt.f32 %v1673_v16 }
0x1378   : > { %v3476_v19 = vpop.eup %3475 }
0x1379   : > { %v1675_v20 = vmul.f32 %v3476_v19, %v1667_v63 }
0x137b   : > { %v1680_v22 = vmul.f32 %v1679_v18, %v1675_v20 }
0x137d   : > { %v1685_v23 = vadd.f32 %v1684_v21, %v1680_v22 }
0x137f   : > { %3175 = vmatmul.mubr.msk.f32.vlgmr.msra.gmra.mrb[4].mxu0 %vm540_vm1, %v1685_v23 }
0x1380   : > { %3189 = vmatprep.mubr.msk.f32.mxu0 %vm3568_vm2, %v3569_v12 }
0x1452   : > { %v1761_v29 = vpop.f32.mrb[4].mxu0 }
0x1453   : > { %v4098_v54 = vadd.f32 %v4095_v25, %v1761_v29  ;;  %v3176_v30 = vpop.f32.mrb[5].mxu0 }
0x1455   : > { %1933 = vrot.lane.b32.xlu0 %v4098_v54, %s3571_s16  ;;  %1767 = vrot.lane.b32.xlu1 %v4098_v54, %s3570_s30  ;;  %v1765_v56 = vmul.f32 0.35355338, %v4098_v54  ;;  %s4357_s30 = smov 56   ;;  %s4358_s16 = smov 48  }
0x1459   : > { %2263 = vrot.lane.b32.xlu0 %v4098_v54, %s3578_s23  ;;  %2098 = vrot.lane.b32.xlu1 %v4098_v54, %s4353_s21  ;;  %s4359_s23 = smov 64   ;;  %s4364_s21 = smov 24  }
0x145d   : > { %1931 = vrot.lane.b32.xlu1 %v1765_v56, %s4354_s22 }
0x1461   : > { %2096 = vrot.lane.b32.xlu1 %v1765_v56, %s4355_s27 }
0x1465   : > { %2261 = vrot.lane.b32.xlu1 %v1765_v56, %s4356_s17 }
0x14c7   : > { %v1934_v31 = vpop.permute.xlu0 %1933  ;;  %v1768_v33 = vpop.permute.xlu1 %1767 }
0x14c8   : > { %3178 = vmatpush3.xpose.msk.msra.mxu1 %vm681_vm3, %v1768_v33  ;;  %3188 = vmatpush3.xpose.msk.msra.mxu0 %vm681_vm3, %v1934_v31 }
0x14c9   : > { %3197 = vmatprep.subr.mxu0 %v3569_v12  ;;  %3182 = vmatprep.subr.mxu1 %v3569_v12 }
0x14cb   : > { %v2099_v34 = vpop.permute.xlu1 %2098  ;;  %3180 = vmatmul.mubr.msk.f32.vlgmr.msra.gmra.mrb[22].mxu1 %vm681_vm3, %v1765_v56  ;;  %v2264_v37 = vpop.permute.xlu0 %2263 }
0x14cc   : > { %3184 = vmatprep.mubr.msk.f32.mxu1 %vm3568_vm2, %v3569_v12 }
0x14cf   : > { %v1932_v35 = vpop.permute.xlu1 %1931 }
0x14d0   : > { %3190 = vmatmul.mubr.msk.f32.vlgmr.msra.gmra.mrb[6].mxu0 %vm681_vm3, %v1932_v35 }
0x14d1   : > { %3198 = vmatpush3.xpose.msk.msra.mxu0 %vm681_vm3, %v2099_v34  ;;  %3199 = vmatprep.mubr.msk.f32.mxu0 %vm3568_vm2, %v3569_v12 }
0x14d2   : > { %3207 = vmatprep.subr.mxu0 %v3569_v12 }
0x14d3   : > { %v2097_v36 = vpop.permute.xlu1 %2096 }
0x14d4   : > { %3200 = vmatmul.mubr.msk.f32.vlgmr.msra.gmra.mrb[8].mxu0 %vm681_vm3, %v2097_v36 }
0x14d5   : > { %3208 = vmatpush3.xpose.msk.msra.mxu0 %vm681_vm3, %v2264_v37  ;;  %3209 = vmatprep.mubr.msk.f32.mxu0 %vm3568_vm2, %v3569_v12 }
0x14d6   : > { %3341 = vmatprep.subr.bf16.mxu0 %v3567_v3 }
0x14d7   : > { %v2262_v38 = vpop.permute.xlu1 %2261 }
0x14d8   : > { %3210 = vmatmul.mubr.msk.f32.vlgmr.msra.gmra.mrb[10].mxu0 %vm681_vm3, %v2262_v38 }
0x14d9   : > { %3225 = vmatprep.mubr.msk.f32.mxu0 %vm3568_vm2, %v3569_v12 }
0x159e   : > { %v1840_v17 = vpop.f32.mrb[22].mxu1 }
0x159f   : > { %v1841_v39 = vadd.f32 %v1840_v17, %v3892_v32  ;;  %v3181_v40 = vpop.f32.mrb[23].mxu1  ;;  %v3439_v17 = vpack.i.bf16 %v4062_v4, %v4057_v2 }
0x15a1   : > { %v1844_v41 = vsel %vm681_vm3, %v1841_v39, -inf }
0x15a2   : > { %1845 = vmax.xlane.f32.xlu0 %v1844_v41 }
0x15a3   : > { %v2005_v42 = vpop.f32.mrb[6].mxu0 }
0x15a4   : > { %v2006_v43 = vadd.f32 %v2005_v42, %v3892_v32  ;;  %v3191_v26 = vpop.f32.mrb[7].mxu0 }
0x15a6   : > { %v2009_v8 = vsel %vm681_vm3, %v2006_v43, -inf }
0x15a7   : > { %2010 = vmax.xlane.f32.xlu1 %v2009_v8  ;;  %v2170_v11 = vpop.f32.mrb[8].mxu0 }
0x15a8   : > { %v2171_v24 = vadd.f32 %v2170_v11, %v3892_v32  ;;  %v3201_v44 = vpop.f32.mrb[9].mxu0 }
0x15aa   : > { %v2174_v45 = vsel %vm681_vm3, %v2171_v24, -inf }
0x15ab   : > { %v2335_v46 = vpop.f32.mrb[10].mxu0  ;;  %2175 = vmax.xlane.f32.xlu0 %v2174_v45 }
0x15ac   : > { %v2336_v47 = vadd.f32 %v2335_v46, %v3892_v32  ;;  %v3211_v49 = vpop.f32.mrb[11].mxu0 }
0x15ae   : > { %v2339_v50 = vsel %vm681_vm3, %v2336_v47, -inf }
0x15af   : > { %2340 = vmax.xlane.f32.xlu0 %v2339_v50 }
0x162f   : > { %v1846_v51 = vpop.xlane.xlu0 %1845 }
0x1630   : > { %v1847_v52 = vsub.f32 %v1841_v39, %v1846_v51  ;;  %v3444_v39 = vpack.i.bf16 %v4074_v10, %v4069_v5 }
0x1632   : > { %v1848_v55 = vmul.f32 1.442695, %v1847_v52 }
0x1634   : > { %3477 = vpow2.f32 %v1848_v55  ;;  %v2011_v6 = vpop.xlane.xlu1 %2010 }
0x1635   : > { %v2012_v7 = vsub.f32 %v2006_v43, %v2011_v6 }
0x1637   : > { %v2013_v9 = vmul.f32 1.442695, %v2012_v7 }
0x1638   : > { %v2176_v57 = vpop.xlane.xlu0 %2175 }
0x1639   : > { %3479 = vpow2.f32 %v2013_v9  ;;  %v2177_v59 = vsub.f32 %v2171_v24, %v2176_v57 }
0x163b   : > { %v2178_v60 = vmul.f32 1.442695, %v2177_v59 }
0x163c   : > { %v2341_v13 = vpop.xlane.xlu0 %2340 }
0x163d   : > { %3481 = vpow2.f32 %v2178_v60  ;;  %v2342_v14 = vsub.f32 %v2336_v47, %v2341_v13 }
0x163e   : > { %v3478_v61 = vpop.eup %3477 }
0x163f   : > { %v1850_v63 = vsel %vm681_vm3, %v3478_v61, 0.0  ;;  %v2343_v15 = vmul.f32 1.442695, %v2342_v14  ;;  %v2967_v14 = vld [vmem:[%s4325_s7 + $0x30] sm:$0xff] }
0x1640   : > { %1851 = vadd.xlane.f32.xlu0 %v1850_v63 }
0x1641   : > { %3483 = vpow2.f32 %v2343_v15  ;;  %v2968_v15 = vld [vmem:[%s4325_s7 + $0x38] sm:$0xff] }
0x1643   : > { %v3480_v32 = vpop.eup %3479 }
0x1644   : > { %v2015_v0 = vsel %vm681_vm3, %v3480_v32, 0.0 }
0x1645   : > { %2016 = vadd.xlane.f32.xlu1 %v2015_v0 }
0x1647   : > { %v3482_v1 = vpop.eup %3481 }
0x1648   : > { %v2180_v48 = vsel %vm681_vm3, %v3482_v1, 0.0 }
0x1649   : > { %2181 = vadd.xlane.f32.xlu0 %v2180_v48  ;;  %v2965_v48 = vld [vmem:[%s4325_s7 + $0x20] sm:$0xff] }
0x164b   : > { %v3484_v16 = vpop.eup %3483 }
0x164c   : > { %v2345_v18 = vsel %vm681_vm3, %v3484_v16, 0.0 }
0x1656   : > { %2020 = vrot.lane.b32.xlu1 %v4098_v54, %s4357_s30 }
0x165a   : > { %2185 = vrot.lane.b32.xlu1 %v4098_v54, %s4358_s16 }
0x165f   : > { %1855 = vrot.lane.b32.xlu0 %v4098_v54, %s4359_s23  ;;  %s431_s23 = sand.u32 1, %s3557_s26  }
0x1660   : > { %s2850_s27 = scalar_lea.sflag [#allocation3], %s431_s23 }
0x1663   : > { %3440 = vrot.lane.b32.xlu0 %v3439_v17, %s4361_s15 }
0x167e   : > { %2346 = vadd.xlane.f32.xlu1 %v2345_v18 }
0x168f   : > { %2350 = vrot.lane.b32.xlu1 %v4098_v54, %s4360_s20  ;;  %s2985_s20 = sshll.u32 %s3678_s29, 4  ;;  %s3586_s29 = smov [#allocation2]  }
0x1690   : > { %s4275_s22 = scalar_lea.hbm %s4331_s13, %s2985_s20  ;;  %s3507_s30 = sshll.u32 %s3586_s29, 4  ;;  %s3508_s30 = int_to_ptr.vmem [resolvable:$false] %s3507_s30 }
0x1691   : > { %s3509_s16 = scalar_lea.vmem %s3508_s30, 32 }
0x1693   : > { %3445 = vrot.lane.b32.xlu1 %v3444_v39, %s4361_s15 }
0x16cd   : > { %v1852_v19 = vpop.xlane.xlu0 %1851 }
0x16ce   : > { %3485 = vrcp.f32 %v1852_v19 }
0x16d2   : > { %v2017_v20 = vpop.xlane.xlu1 %2016 }
0x16d3   : > { %3487 = vrcp.f32 %v2017_v20 }
0x16d6   : > { %v2182_v21 = vpop.xlane.xlu0 %2181  ;;  %v2021_v29 = vpop.permute.xlu1 %2020 }
0x16d7   : > { %3489 = vrcp.f32 %v2182_v21  ;;  %v2550_v21 = vrot.slane %v4083_v62, %v1464_v27  ;;  %v2974_v27 = vld [vmem:[%s4327_s9 + $0x48] sm:$0xff] }
0x16d8   : > { %v3486_v22 = vpop.eup %3485 }
0x16d9   : > { %v1854_v23 = vmul.f32 %v3486_v22, %v3478_v61 }
0x16da   : > { %v1856_v30 = vpop.permute.xlu0 %1855  ;;  %v2186_v31 = vpop.permute.xlu1 %2185 }
0x16db   : > { %3183 = vmatpush3.msra.mxu1 %v1856_v30 }
0x16dc   : > { %3185 = vmatmul.mubr.msk.f32.vlgmr.msra.gmra.mrb[24].mxu1 %vm681_vm3, %v1854_v23  ;;  %3192 = vmatprep.subr.mxu1 %v3569_v12 }
0x16dd   : > { %v3488_v56 = vpop.eup %3487  ;;  %3193 = vmatpush3.msra.mxu1 %v2021_v29  ;;  %3194 = vmatprep.mubr.msk.f32.mxu1 %vm3568_vm2, %v3569_v12  ;;  %v2555_v29 = vrot.slane %v4083_v62, %v1469_v28  ;;  %v2977_v62 = vld [vmem:[%s4327_s9 + $0x60] sm:$0xff] }
0x16de   : > { %v2019_v54 = vmul.f32 %v3488_v56, %v3480_v32  ;;  %3202 = vmatprep.subr.mxu1 %v3569_v12  ;;  %v3441_v40 = vpop.permute.xlu0 %3440 }
0x16df   : > { %v3443_v41 = vunpack.i.h.bf16 %v3441_v40  ;;  %v3442_v42 = vunpack.i.l.bf16 %v3441_v40 }
0x16e0   : > { %3195 = vmatmul.mubr.msk.f32.vlgmr.msra.gmra.mrb[26].mxu1 %vm681_vm3, %v2019_v54  ;;  %v2973_v54 = vld [vmem:[%s4327_s9 + $0x40] sm:$0xff] }
0x16e1   : > { %v3490_v33 = vpop.eup %3489  ;;  %3203 = vmatpush3.msra.mxu1 %v2186_v31  ;;  %3204 = vmatprep.mubr.msk.f32.mxu1 %vm3568_vm2, %v3569_v12  ;;  %v3342_v43 = vpack.c.bf16 %v3443_v41, %v3442_v42  ;;  %v3354_v31 = vpack.c.bf16 %v2974_v27, %v2973_v54 }
0x16e2   : > { %v2184_v34 = vmul.f32 %v3490_v33, %v3482_v1  ;;  %3212 = vmatprep.subr.mxu1 %v3569_v12  ;;  %v2978_v33 = vld [vmem:[%s4327_s9 + $0x68] sm:$0xff] }
0x16e3   : > { %3343 = vmatpush3.bf16.msra.mxu0 %v3342_v43 }
0x16e4   : > { %3205 = vmatmul.mubr.msk.f32.vlgmr.msra.gmra.mrb[28].mxu1 %vm681_vm3, %v2184_v34  ;;  %3344 = vmatprep.subr.bf16.mxu0 %v3567_v3  ;;  %v3360_v34 = vpack.c.bf16 %v2978_v33, %v2977_v62 }
0x16e5   : > { %3214 = vmatprep.mubr.msk.f32.mxu1 %vm3568_vm2, %v3569_v12 }
0x170b   : > { %v2347_v35 = vpop.xlane.xlu1 %2346 }
0x170c   : > { %3491 = vrcp.f32 %v2347_v35  ;;  %v2979_v35 = vld [vmem:[%s4327_s9 + $0x70] sm:$0xff] }
0x170f   : > { %v2351_v36 = vpop.permute.xlu1 %2350 }
0x1710   : > { %3213 = vmatpush3.msra.mxu1 %v2351_v36  ;;  %v2980_v36 = vld [vmem:[%s4327_s9 + $0x78] sm:$0xff] }
0x1711   : > { %3347 = vmatprep.subr.bf16.mxu1 %v3567_v3 }
0x1713   : > { %v3446_v26 = vpop.permute.xlu1 %3445 }
0x1714   : > { %v3448_v8 = vunpack.i.h.bf16 %v3446_v26  ;;  %v3447_v11 = vunpack.i.l.bf16 %v3446_v26 }
0x1716   : > { %v3492_v37 = vpop.eup %3491  ;;  %v3345_v24 = vpack.c.bf16 %v3448_v8, %v3447_v11 }
0x1717   : > { %v2349_v38 = vmul.f32 %v3492_v37, %v3484_v16  ;;  %v3351_v16 = vpack.c.bf16 %v2968_v15, %v2967_v14  ;;  %v3363_v37 = vpack.c.bf16 %v2980_v36, %v2979_v35 }
0x1718   : > { %3346 = vmatpush3.bf16.msra.mxu0 %v3345_v24 }
0x1719   : > { %3215 = vmatmul.mubr.msk.f32.vlgmr.msra.gmra.mrb[30].mxu1 %vm681_vm3, %v2349_v38  ;;  %3353 = vmatprep.subr.bf16.mxu0 %v3567_v3  ;;  %v2970_v38 = vld [vmem:[%s4326_s8 + $0x1] ss:$0 sm:$0xff] }
0x171a   : > { %3236 = vmatprep.mubr.msk.f32.mxu1 %vm3568_vm2, %v3569_v12 }
0x17af   : > { %v1927_v2 = vpop.f32.mrb[24].mxu1 }
0x17b0   : > { %v3186_v4 = vpop.f32.mrb[25].mxu1 }
0x17b3   : > { %v2092_v44 = vpop.f32.mrb[26].mxu1 }
0x17b4   : > { %2427 = vrot.lane.b32.xlu0 %v2092_v44, %s4362_s14  ;;  %v3196_v5 = vpop.f32.mrb[27].mxu1 }
0x17b7   : > { %v2257_v10 = vpop.f32.mrb[28].mxu1 }
0x17b8   : > { %2431 = vrot.lane.b32.xlu1 %v2257_v10, %s4363_s24  ;;  %v3206_v45 = vpop.f32.mrb[29].mxu1 }
0x17bc   : > { %2457 = vrot.lane.b32.xlu1 %v4095_v25, %s4361_s15  ;;  %s432_s15 = scalar_lea.vmem [#allocation2], %s431_s23 }
0x17bd   : > { %s2862_s14 = sshll.u32 %s432_s15, 4  ;;  %s4277_s14 = int_to_ptr.vmem [resolvable:$true] %s2862_s14 }
0x17be   : > { %s3503_s17 = scalar_lea.vmem %s4277_s14, 16  ;;  %p3510_p0 = scmp.lt.s32.totalorder %s4277_s14, %s3508_s30 }
0x17bf   : > { %p3504_p11 = scmp.ne.s32.totalorder %s4277_s14, %s3503_s17  ;;  %p3511_p1 = scmp.lt.s32.totalorder %s3509_s16, %s3503_s17 }
0x17c1   : > { %p3505_p12 = pnand %p3504_p11, %p3695_p5  ;;  %p3512_p2 = por %p3511_p1, %p3510_p0 }
0x17c3   : > { %p3506_p13 = pneg %p3505_p12 }
0x17c5   : > { %p3513_p3 = pnand %p3512_p2, %p3506_p13 }
0x17ec   : > { %v2422_v46 = vpop.f32.mrb[30].mxu1 }
0x17ed   : > { %2435 = vrot.lane.b32.xlu0 %v2422_v46, %s4364_s21  ;;  %v3216_v47 = vpop.f32.mrb[31].mxu1 }
0x1826   : > { %v2428_v49 = vpop.permute.xlu0 %2427 }
0x1827   : > { %v2438_v51 = vsel %vm681_vm3, %v1927_v2, %v2428_v49  ;;  %v2983_v2 = vld [vmem:[%s4328_s10 + $0x1] ss:$0 sm:$0xff] }
0x182a   : > { %v2432_v50 = vpop.permute.xlu1 %2431 }
0x182b   : > { %v2439_v52 = vsel %vm1352_vm5, %v2438_v51, %v2432_v50  ;;  %v2763_v51 = vld [vmem:[%s4330_s12] sm:$0xff] }
0x182e   : > { %v2458_v7 = vpop.permute.xlu1 %2457 }
0x185f   : > { %v2436_v55 = vpop.permute.xlu0 %2435 }
0x1860   : > { %v2440_v6 = vsel %vm1354_vm6, %v2439_v52, %v2436_v55  ;;  %v2764_v52 = vld [vmem:[%s4330_s12 + $0x8] sm:$0xff] }
0x1861   : > { %3226 = vmatmul.mubr.msk.f32.vlgmr.msra.gmra.mrb[12].mxu0 %vm540_vm1, %v2440_v6  ;;  %v3366_v55 = vpack.c.bf16 %v2764_v52, %v2763_v51  ;;  %v2765_v6 = vld [vmem:[%s4330_s12 + $0x10] sm:$0xff] }
0x1862   : > { %3255 = vmatprep.mubr.msk.f32.mxu0 %vm3568_vm2, %v3569_v12  ;;  %3355 = vmatpush3.bf16.msra.mxu0 %v3354_v31 }
0x1863   : > { %3356 = vmatprep.subr.bf16.mxu0 %v3567_v3 }
0x1934   : > { %v2529_v25 = vpop.f32.mrb[12].mxu0 }
0x1935   : > { %v2530_v9 = vadd.f32 %v2529_v25, %v2458_v7  ;;  %v3227_v57 = vpop.f32.mrb[13].mxu0  ;;  %v2766_v7 = vld [vmem:[%s4330_s12 + $0x18] sm:$0xff] }
0x1936   : > { %v3369_v25 = vpack.c.bf16 %v2766_v7, %v2765_v6 }
0x1937   : > { %v4188_v59 = vadd.f32 %v2530_v9, %v4048_v58  ;;  %v2966_v58 = vld [vmem:[%s4325_s7 + $0x28] sm:$0xff] }
0x1938   : > { %v3348_v13 = vpack.c.bf16 %v2966_v58, %v2965_v48 }
0x1939   : > { %v2534_v60 = vsel %vm540_vm1, %v4188_v59, 0.0 }
0x193a   : > { %2535 = vadd.xlane.f32.xlu0 %v2534_v60  ;;  %3349 = vmatpush3.bf16.msra.mxu1 %v3348_v13  ;;  %v2743_v60 = vld [vmem:[%s4329_s11] sm:$0x3] }
0x193b   : > { %3350 = vmatprep.subr.bf16.mxu1 %v3567_v3 }
0x193e   : > { %3352 = vmatpush3.bf16.msra.mxu1 %v3351_v16 }
0x193f   : > { %3365 = vmatprep.subr.bf16.mxu1 %v3567_v3 }
0x19c7   : > { %v2536_v61 = vpop.xlane.xlu0 %2535 }
0x19c8   : > { %v2537_v63 = vmul.f32 0.03125, %v2536_v61 }
0x19ca   : > { %v2538_v32 = vsub.f32 %v4188_v59, %v2537_v63 }
0x19cc   : > { %v2539_v0 = vmul.f32 %v2538_v32, %v2538_v32 }
0x19ce   : > { %v2540_v1 = vsel %vm540_vm1, %v2539_v0, 0.0 }
0x19cf   : > { %2541 = vadd.xlane.f32.xlu1 %v2540_v1 }
0x1a5c   : > { %v2542_v18 = vpop.xlane.xlu1 %2541 }
0x1a5d   : > { %v2543_v19 = vmul.f32 0.03125, %v2542_v18 }
0x1a5f   : > { %v2544_v20 = vadd.f32 1e-05, %v2543_v19 }
0x1a61   : > { %3493 = vrsqrt.f32 %v2544_v20 }
0x1a6b   : > { %v3494_v22 = vpop.eup %3493 }
0x1a6c   : > { %v2546_v23 = vmul.f32 %v3494_v22, %v2538_v32  ;;  %v2760_v32 = vrot.slane %v2743_v60, 1 }
0x1a6e   : > { %v2551_v30 = vmul.f32 %v2550_v21, %v2546_v23 }
0x1a70   : > { %v2556_v56 = vadd.f32 %v2555_v29, %v2551_v30 }
0x1a72   : > { %3237 = vmatmul.mubr.msk.f32.vlgmr.msra.gmra.mrb[32].mxu1 %vm540_vm1, %v2556_v56 }
0x1a73   : > { %3266 = vmatprep.mubr.msk.f32.mxu1 %vm3568_vm2, %v3569_v12  ;;  %v2976_v12 = vld [vmem:[%s4327_s9 + $0x58] sm:$0xff]  ;;  %3367 = vmatpush3.bf16.msra.mxu1 %v3366_v55 }
0x1a74   : > { %v3357_v28 = vpack.c.bf16 %v2976_v12, %v2975_v53  ;;  %3368 = vmatprep.subr.bf16.mxu1 %v3567_v3 }
0x1a76   : > { %3358 = vmatpush3.bf16.msra.mxu0 %v3357_v28 }
0x1a77   : > { %3359 = vmatprep.subr.bf16.mxu0 %v3567_v3  ;;  %3370 = vmatpush3.bf16.msra.mxu1 %v3369_v25 }
0x1a7a   : > { %3361 = vmatpush3.bf16.msra.mxu0 %v3360_v34 }
0x1a7b   : > { %3362 = vmatprep.subr.bf16.mxu0 %v3567_v3 }
0x1a7e   : > { %3364 = vmatpush3.bf16.msra.mxu0 %v3363_v37 }
0x1b45   : > { %v2639_v17 = vpop.f32.mrb[32].mxu1 }
0x1b46   : > { %v2640_v39 = vadd.f32 %v2970_v38, %v2639_v17  ;;  %v3238_v40 = vpop.f32.mrb[33].mxu1 }
0x1b48   : > { %v2972_v41 = vmul.f32 -1.702, %v2640_v39 }
0x1b4a   : > { %v2645_v42 = vmul.f32 1.442695, %v2972_v41 }
0x1b4c   : > { %3495 = vpow2.f32 %v2645_v42 }
0x1b56   : > { %v3496_v43 = vpop.eup %3495 }
0x1b57   : > { %v2647_v26 = vadd.f32 1.0, %v3496_v43 }
0x1b59   : > { %3497 = vrcp.f32 %v2647_v26 }
0x1b63   : > { %v3498_v8 = vpop.eup %3497 }
0x1b64   : > { %v2650_v11 = vmul.f32 %v3498_v8, %v2640_v39 }
0x1b66   : > { %3256 = vmatmul.mubr.msk.f32.vlgmr.msra.gmra.mrb[14].mxu0 %vm465_vm0, %v2650_v11 }
0x1c39   : > { %v2729_v24 = vpop.f32.mrb[14].mxu0 }
0x1c3a   : > { %v2733_v4 = vadd.f32 %v2729_v24, %v4188_v59  ;;  %v3257_v44 = vpop.f32.mrb[15].mxu0 }
0x1c3c   : > { %v2742_v5 = vadd.f32 %v2983_v2, %v2733_v4 }
0x1c3e   : > { %v2745_v10 = vsel %vm2744_vm7, %v2742_v5, 0.0 }
0x1c3f   : > { %2746 = vadd.xlane.f32.xlu0 %v2745_v10 }
0x1ccc   : > { %v2747_v45 = vpop.xlane.xlu0 %2746 }
0x1ccd   : > { %v2748_v46 = vmul.f32 0.03125, %v2747_v45 }
0x1ccf   : > { %v2749_v47 = vsub.f32 %v2742_v5, %v2748_v46 }
0x1cd1   : > { %v2750_v49 = vmul.f32 %v2749_v47, %v2749_v47 }
0x1cd3   : > { %v2751_v50 = vsel %vm2744_vm7, %v2750_v49, 0.0 }
0x1cd4   : > { %2752 = vadd.xlane.f32.xlu0 %v2751_v50 }
0x1d61   : > { %v2753_v9 = vpop.xlane.xlu0 %2752 }
0x1d62   : > { %v2754_v57 = vmul.f32 0.03125, %v2753_v9 }
0x1d64   : > { %v2755_v59 = vadd.f32 1e-05, %v2754_v57 }
0x1d66   : > { %3499 = vrsqrt.f32 %v2755_v59 }
0x1d70   : > { %v3500_v61 = vpop.eup %3499 }
0x1d71   : > { %v2757_v63 = vmul.f32 %v3500_v61, %v2749_v47 }
0x1d73   : > { %v2758_v0 = vmul.f32 %v2757_v63, %v2743_v60 }
0x1d75   : > { %v2762_v1 = vadd.f32 %v2760_v32, %v2758_v0 }
0x1d77   : > { %3267 = vmatmul.mubr.msk.f32.vlgmr.msra.gmra.mrb[34].mxu1 %vm540_vm1, %v2762_v1 }
0x1e4a   : > { %v2836_v3 = vpop.f32.mrb[34].mxu1 }
0x1e4b   : > { %v2840_v48 = vmul.f32 %v2836_v3, %v2836_v3  ;;  %v3268_v58 = vpop.f32.mrb[35].mxu1 }
0x1e4d   : > { %v2842_v13 = vsel %vm2841_vm8, %v2840_v48, 0.0 }
0x1e4e   : > { %2843 = vadd.xlane.f32.xlu0 %v2842_v13 }
0x1edb   : > { %v2844_v14 = vpop.xlane.xlu0 %2843 }
0x1edc   : > { %v2845_v15 = vadd.f32 1e-12, %v2844_v14 }
0x1ede   : > { %3501 = vrsqrt.f32 %v2845_v15 }
0x1ee8   : > { %v3502_v16 = vpop.eup %3501 }
0x1ee9   : > { %v2847_v18 = vmul.f32 %v3502_v16, %v2836_v3 }
0x1eeb   : > { %2848 = vst.msk [vmem:[%s432_s15] sm:$0x1] %vm2841_vm8, %v2847_v18 }
0x1eec   : > { %3516 = shalt.err (!%p3513_p3)
}
0x1eed   : > { %s3517_s23 = scalar_lea.hbm %s4275_s22, 16  ;;  %s3521_s24 = scalar_lea.hbm %s4331_s13, 32 }
0x1eee   : > { %p3518_p4 = scmp.ne.s32.totalorder %s4275_s22, %s3517_s23  ;;  %p3522_p9 = scmp.lt.u32.totalorder %s4275_s22, %s4331_s13 }
0x1eef   : > { %p3523_p10 = scmp.lt.u32.totalorder %s3521_s24, %s3517_s23  ;;  %p3525_p12 = scmp.lt.u32.totalorder %s3517_s23, %s4275_s22 }
0x1ef0   : > { %p3519_p7 = pnand %p3518_p4, %p3695_p5 }
0x1ef1   : > { %p3524_p11 = por %p3523_p10, %p3522_p9 }
0x1ef2   : > { %p3520_p8 = pneg %p3519_p7 }
0x1ef3   : > { %p3526_p13 = por %p3525_p12, %p3524_p11 }
0x1ef5   : > { %p3527_p0 = pnand %p3526_p13, %p3520_p8 }
0x1ef7   : > { %3530 = shalt.err (!%p3527_p0)
}
0x1ef8   : > { %3371 = dma.vmem_to_hbm [thread:$0]  (%p3695_p5), %s4277_s14, 16, %s4275_s22, %s2850_s27  }
0x1ef9 PF: > { %p3377_p1 = scmp.ge.s32.totalorder %s3565_s28, 2  ;;  %s2874_s17 = sand.u32 1, %s3553_s25  }
0x1efa   : > { %s2875_s30 = scalar_lea.sflag [#allocation3], %s2874_s17 }
0x1efb   : > { %p3374_p2 = pnand %p3377_p1, %p3699_p6 }
0x1efd   : > { %3548 = dma.done.wait (!%p3374_p2), %s2875_s30, 16  }
0x1efe   : > { %3550 = vsyncadd (!%p3374_p2), %s2875_s30, 4294967280  ;;  %s4365_s28 = sld [smem:[#allocation6_spill]]  ;;  %s4366_s16 = sld [smem:[#allocation5_spill]] }
0x1eff   : > { %s4367_s27 = sld [smem:[#allocation7_spill]]  ;;  %s4368_s25 = smov %s3557_s26 }
0x1f04   : > { %p23_p3 = scmp.ge.s32.totalorder %s4365_s28, 4   ;;  %s4369_s26 = smov %s4366_s16 }
0x1f06   :  { %25 = sbr.rel (!%p23_p3) target bundleno = 3 (0x3), region = 114 }
0x1f0d   :  { %2879 = vsyncpa [#allocation3], 1 }
0x1f0e   :  { %2881 = vsyncpa [#allocation3 + $0x1], 1 }

</bundles_post_ra>
